<compile_context>
chip_gen: v7x
topology: tpu7x:2x2x1
jax: 0.10.0
libtpu: 0.0.40
codegen_flags: <defaults>
</compile_context>

<pallas_src>
import functools

import jax
import jax.numpy as jnp
from jax.experimental import pallas as pl
from jax.experimental.pallas import tpu as pltpu

NUM_BINS = 118  # depth bins (one-hot of 119 classes with class 0 dropped)
LANE = 128


def _round_up(x: int, m: int) -> int:
    return ((x + m - 1) // m) * m


def _bce_kernel(preds_ref, labels_ref, out_ref, *, scale):
    """One (batch, spatial-tile) block of the BCE depth loss.

    preds_ref : (1, C, t_s)  float32 probabilities in [0, 1] (channel-major)
    labels_ref: (1, 1, t_s)  int32 depth-bin indices in [0, C]
    out_ref   : (1, 1, 1)    float32 per-batch partial loss (resident over s)
    """
    s = pl.program_id(1)

    @pl.when(s == 0)
    def _():
        out_ref[...] = jnp.zeros_like(out_ref)

    p = preds_ref[0]       # (C, t_s) f32
    lab = labels_ref[0]    # (1, t_s) i32

    # One log per element: the negative-class term for every element ...
    log_1mp = jnp.maximum(jnp.log(1.0 - p), -100.0)              # (C, t_s)

    # ... plus a per-position correction at the label channel (lab >= 1).
    cls = jax.lax.broadcasted_iota(jnp.int32, p.shape, 0) + 1    # (C, t_s)
    mask = lab == cls                                            # (C, t_s)
    p_lab = jnp.sum(jnp.where(mask, p, 0.0), axis=0, keepdims=True)        # (1, t_s)
    l1_lab = jnp.sum(jnp.where(mask, log_1mp, 0.0), axis=0, keepdims=True)  # (1, t_s)
    log_p_lab = jnp.maximum(jnp.log(p_lab), -100.0)              # only ~1/C extra logs
    corr = jnp.where(lab >= 1, log_p_lab - l1_lab, 0.0)          # (1, t_s); padded cols -> 0

    tile_sum = jnp.sum(log_1mp) + jnp.sum(corr)
    out_ref[...] += -tile_sum * scale


def bce_depth_loss(preds_S, preds_T, *, loss_weight=1.0, tile_s=2048):
    """preds_S: [N, 118, D2, D3] float probabilities (NCHW, native layout).
       preds_T: [N, D2, D3] integer depth labels in [0, 118].
       Returns scalar float32 loss."""
    N, C, D2, D3 = preds_S.shape
    assert C == NUM_BINS
    assert preds_T.shape[-2:] == preds_S.shape[-2:] and preds_T.shape[0] == N, \
        "the output dim of teacher and student differ"

    S = D2 * D3
    M = N * S
    scale = float(loss_weight) / max(1.0, float(M))

    # Free reshapes only -- no transpose, no extra HBM traffic for preds.
    preds = preds_S.astype(jnp.float32).reshape(N, C, S)
    labels = preds_T.astype(jnp.int32).reshape(N, 1, S)

    # Lane-dense spatial tiling: t_s is a multiple of 128, balanced across the
    # tile count so padding is minimal.
    t_s0 = max(LANE, min(int(tile_s), _round_up(S, LANE)))
    num_tiles = pl.cdiv(S, t_s0)
    t_s = _round_up(pl.cdiv(S, num_tiles), LANE)
    S_pad = num_tiles * t_s
    if S_pad != S:
        # Padded columns have p = 0 and label = 0 -> exactly zero loss.
        preds = jnp.pad(preds, ((0, 0), (0, 0), (0, S_pad - S)))
        labels = jnp.pad(labels, ((0, 0), (0, 0), (0, S_pad - S)))

    grid = (N, num_tiles)

    out = pl.pallas_call(
        functools.partial(_bce_kernel, scale=scale),
        out_shape=jax.ShapeDtypeStruct((N, 1, 1), jnp.float32),
        grid_spec=pltpu.PrefetchScalarGridSpec(
            num_scalar_prefetch=0,
            grid=grid,
            in_specs=[
                pl.BlockSpec((1, C, t_s), lambda n, s: (n, 0, s)),
                pl.BlockSpec((1, 1, t_s), lambda n, s: (n, 0, s)),
            ],
            out_specs=pl.BlockSpec((1, 1, 1), lambda n, s: (n, 0, 0)),
        ),
        compiler_params=pltpu.CompilerParams(
            # batch axis can shard across TensorCores; spatial axis accumulates
            dimension_semantics=("parallel", "arbitrary"),
        ),
    )(preds, labels)
    return jnp.sum(out)


def _reference_loss(preds_S, preds_T, loss_weight=1.0):
    """Pure-JAX reference mirroring the PyTorch forward."""
    p = jnp.transpose(preds_S, (0, 2, 3, 1)).reshape(-1, NUM_BINS)
    p = p.astype(jnp.float32)
    y = jax.nn.one_hot(preds_T.reshape(-1), NUM_BINS + 1,
                       dtype=jnp.float32)[:, 1:]
    log_p = jnp.maximum(jnp.log(p), -100.0)
    log_1mp = jnp.maximum(jnp.log(1.0 - p), -100.0)
    loss = -(y * log_p + (1.0 - y) * log_1mp)
    return loss_weight * loss.sum() / max(1.0, float(y.shape[0]))


if __name__ == "__main__":
    key = jax.random.PRNGKey(0)
    k1, k2, k3, k4 = jax.random.split(key, 4)

    # Case 1: non-square spatial dims (exercises row-ordering), S = 512.
    N, C, D2, D3 = 2, NUM_BINS, 16, 32
    logits = jax.random.normal(k1, (N, C, D2, D3), dtype=jnp.float32)
    preds_S = jax.nn.softmax(logits, axis=1)          # valid probabilities
    preds_T = jax.random.randint(k2, (N, D2, D3), 0, NUM_BINS + 1,
                                 dtype=jnp.int32)
    loss = jax.block_until_ready(bce_depth_loss(preds_S, preds_T,
                                                loss_weight=1.0))
    ref = _reference_loss(preds_S, preds_T, loss_weight=1.0)
    assert jnp.allclose(loss, ref, rtol=1e-5, atol=1e-5), (loss, ref)

    # Case 2: spatial size not a multiple of 128 (exercises zero-padding path).
    N2, D2b, D3b = 2, 8, 20
    logits2 = jax.random.normal(k3, (N2, C, D2b, D3b), dtype=jnp.float32)
    preds_S2 = jax.nn.softmax(logits2, axis=1)
    preds_T2 = jax.random.randint(k4, (N2, D2b, D3b), 0, NUM_BINS + 1,
                                  dtype=jnp.int32)
    loss2 = jax.block_until_ready(bce_depth_loss(preds_S2, preds_T2,
                                                 loss_weight=0.5))
    ref2 = _reference_loss(preds_S2, preds_T2, loss_weight=0.5)
    assert jnp.allclose(loss2, ref2, rtol=1e-5, atol=1e-5), (loss2, ref2)

    print("KERNEL_OK")
</pallas_src>

<mosaic_0001>
module attributes {stable_mosaic.version = 11 : i64} {
  func.func @_bce_kernel(%arg0: i32, %arg1: i32, %arg2: memref<1x118x512xf32, #tpu.memory_space<vmem>>, %arg3: memref<1x1x512xi32, #tpu.memory_space<vmem>>, %arg4: memref<1x1x1xf32, #tpu.memory_space<vmem>>) attributes {dimension_semantics = [#tpu.dimension_semantics<parallel>, #tpu.dimension_semantics<arbitrary>], iteration_bounds = array<i64: 2, 1>, scalar_prefetch = 0 : i64, scratch_operands = 0 : i64, tpu.core_type = #tpu.core_type<tc>, window_params = [{transform_indices = @transform_0, window_bounds = array<i64: 1, 118, 512>}, {transform_indices = @transform_1, window_bounds = array<i64: 1, 1, 512>}, {transform_indices = @transform_2, window_bounds = array<i64: 1, 1, 1>}]} {
    %c0_i32 = arith.constant 0 : i32
    %0 = arith.cmpi eq, %arg1, %c0_i32 : i32
    %1 = arith.extui %0 : i1 to i32
    %c0_i32_0 = arith.constant 0 : i32
    %2 = arith.cmpi ne, %1, %c0_i32_0 : i32
    scf.if %2 {
      %cst_24 = arith.constant 0.000000e+00 : f32
      %48 = vector.broadcast %cst_24 : f32 to vector<1x1x1xf32>
      %c0_25 = arith.constant 0 : index
      %c0_26 = arith.constant 0 : index
      %c0_27 = arith.constant 0 : index
      %49 = vector.load %arg4[%c0_25, %c0_26, %c0_27] : memref<1x1x1xf32, #tpu.memory_space<vmem>>, vector<1x1x1xf32>
      tpu.vector_store %arg4[%c0_25, %c0_26, %c0_27], %48 {strides = array<i32>} : memref<1x1x1xf32, #tpu.memory_space<vmem>>, vector<1x1x1xf32>,
    } else {
    }
    %c0 = arith.constant 0 : index
    %c0_1 = arith.constant 0 : index
    %c0_2 = arith.constant 0 : index
    %3 = vector.load %arg2[%c0, %c0_1, %c0_2] : memref<1x118x512xf32, #tpu.memory_space<vmem>>, vector<1x118x512xf32>
    %4 = vector.shape_cast %3 : vector<1x118x512xf32> to vector<118x512xf32>
    %c0_3 = arith.constant 0 : index
    %c0_4 = arith.constant 0 : index
    %c0_5 = arith.constant 0 : index
    %5 = vector.load %arg3[%c0_3, %c0_4, %c0_5] : memref<1x1x512xi32, #tpu.memory_space<vmem>>, vector<1x1x512xi32>
    %6 = vector.shape_cast %5 : vector<1x1x512xi32> to vector<1x512xi32>
    %cst = arith.constant 1.000000e+00 : f32
    %7 = vector.broadcast %cst : f32 to vector<118x512xf32>
    %8 = arith.subf %7, %4 : vector<118x512xf32>
    %9 = math.log %8 : vector<118x512xf32>
    %cst_6 = arith.constant -1.000000e+02 : f32
    %10 = vector.broadcast %cst_6 : f32 to vector<118x512xf32>
    %11 = arith.maximumf %9, %10 : vector<118x512xf32>
    %12 = tpu.iota {dimensions = array<i32: 0>} : vector<118x512xi32>
    %c1_i32 = arith.constant 1 : i32
    %13 = vector.broadcast %c1_i32 : i32 to vector<118x512xi32>
    %14 = arith.addi %12, %13 : vector<118x512xi32>
    %15 = vector.broadcast %6 : vector<1x512xi32> to vector<118x512xi32>
    %16 = arith.cmpi eq, %15, %14 : vector<118x512xi32>
    %cst_7 = arith.constant 0.000000e+00 : f32
    %17 = vector.broadcast %cst_7 : f32 to vector<118x512xf32>
    %18 = arith.select %16, %4, %17 : vector<118x512xi1>, vector<118x512xf32>
    %cst_8 = arith.constant dense<0.000000e+00> : vector<512xf32>
    %19 = vector.multi_reduction <add>, %18, %cst_8 [0] : vector<118x512xf32> to vector<512xf32>
    %20 = vector.shape_cast %19 : vector<512xf32> to vector<1x512xf32>
    %cst_9 = arith.constant 0.000000e+00 : f32
    %21 = vector.broadcast %cst_9 : f32 to vector<118x512xf32>
    %22 = arith.select %16, %11, %21 : vector<118x512xi1>, vector<118x512xf32>
    %cst_10 = arith.constant dense<0.000000e+00> : vector<512xf32>
    %23 = vector.multi_reduction <add>, %22, %cst_10 [0] : vector<118x512xf32> to vector<512xf32>
    %24 = vector.shape_cast %23 : vector<512xf32> to vector<1x512xf32>
    %25 = math.log %20 : vector<1x512xf32>
    %cst_11 = arith.constant -1.000000e+02 : f32
    %26 = vector.broadcast %cst_11 : f32 to vector<1x512xf32>
    %27 = arith.maximumf %25, %26 : vector<1x512xf32>
    %c1_i32_12 = arith.constant 1 : i32
    %28 = vector.broadcast %c1_i32_12 : i32 to vector<1x512xi32>
    %29 = arith.cmpi sge, %6, %28 : vector<1x512xi32>
    %30 = arith.subf %27, %24 : vector<1x512xf32>
    %cst_13 = arith.constant 0.000000e+00 : f32
    %31 = vector.broadcast %cst_13 : f32 to vector<1x512xf32>
    %32 = arith.select %29, %30, %31 : vector<1x512xi1>, vector<1x512xf32>
    %33 = vector.shape_cast %11 : vector<118x512xf32> to vector<1x118x512xf32>
    %cst_14 = arith.constant dense<0.000000e+00> : vector<1xf32>
    %34 = vector.multi_reduction <add>, %33, %cst_14 [1, 2] : vector<1x118x512xf32> to vector<1xf32>
    %35 = vector.shape_cast %34 : vector<1xf32> to vector<1x1x1xf32>
    %36 = vector.extract %35[0, 0, 0] : f32 from vector<1x1x1xf32>
    %37 = vector.shape_cast %32 : vector<1x512xf32> to vector<1x1x512xf32>
    %cst_15 = arith.constant dense<0.000000e+00> : vector<1xf32>
    %38 = vector.multi_reduction <add>, %37, %cst_15 [1, 2] : vector<1x1x512xf32> to vector<1xf32>
    %39 = vector.shape_cast %38 : vector<1xf32> to vector<1x1x1xf32>
    %40 = vector.extract %39[0, 0, 0] : f32 from vector<1x1x1xf32>
    %41 = arith.addf %36, %40 : f32
    %c0_16 = arith.constant 0 : index
    %c0_17 = arith.constant 0 : index
    %c0_18 = arith.constant 0 : index
    %42 = vector.load %arg4[%c0_16, %c0_17, %c0_18] : memref<1x1x1xf32, #tpu.memory_space<vmem>>, vector<1x1x1xf32>
    %cst_19 = arith.constant 0.000000e+00 : f32
    %43 = arith.subf %cst_19, %41 : f32
    %cst_20 = arith.constant 9.765625E-4 : f32
    %44 = arith.mulf %43, %cst_20 : f32
    %45 = vector.broadcast %44 : f32 to vector<1x1x1xf32>
    %46 = arith.addf %42, %45 : vector<1x1x1xf32>
    %c0_21 = arith.constant 0 : index
    %c0_22 = arith.constant 0 : index
    %c0_23 = arith.constant 0 : index
    %47 = vector.load %arg4[%c0_21, %c0_22, %c0_23] : memref<1x1x1xf32, #tpu.memory_space<vmem>>, vector<1x1x1xf32>
    tpu.vector_store %arg4[%c0_21, %c0_22, %c0_23], %46 {strides = array<i32>} : memref<1x1x1xf32, #tpu.memory_space<vmem>>, vector<1x1x1xf32>,
    return
  }
  func.func @transform_0(%arg0: i32, %arg1: i32) -> (i32, i32, i32) {
    %c0_i32 = arith.constant 0 : i32
    %c0_i32_0 = arith.constant 0 : i32
    return %arg0, %c0_i32, %arg1 : i32, i32, i32
  }
  func.func @transform_1(%arg0: i32, %arg1: i32) -> (i32, i32, i32) {
    %c0_i32 = arith.constant 0 : i32
    %c0_i32_0 = arith.constant 0 : i32
    return %arg0, %c0_i32, %arg1 : i32, i32, i32
  }
  func.func @transform_2(%arg0: i32, %arg1: i32) -> (i32, i32, i32) {
    %c0_i32 = arith.constant 0 : i32
    %c0_i32_0 = arith.constant 0 : i32
    %c0_i32_1 = arith.constant 0 : i32
    return %arg0, %c0_i32, %c0_i32_0 : i32, i32, i32
  }
}

</mosaic_0001>

<bundles_post_ra>
// kernel: tpu_custom_call.1
= control target key start
LH: loop header
LB: loop body
LE: loop exit
PB: predicated region body
PF: predicated region fallthrough
CT: control target
= control target key end

     0   :  { %s1354_s9 = smov 0   ;;  %s1356_s10 = smov 0   ;;  %s2848_s0 = inlined_call_operand.vmem [shape: f32[2,118,512], index: 0, kind: input, shape index: {}]   ;;  %s2849_s1 = inlined_call_operand.vmem [shape: s32[2,1,512], index: 1, kind: input, shape index: {}]   ;;  %s2850_s2 = inlined_call_operand.vmem [shape: f32[2,1,1], index: 2, kind: output, shape index: {}]  }
   0x1   :  { %s1358_s11 = smov 0  }
   0x2 LB: > { %s24_s12 = sadd.s32 1, %s1331_s10  ;;  %p1149_p0 = scmp.ge.s32.totalorder %s1335_s11, 1  ;;  %s1335_s11 = sphi %s1358_s11, %s12_s11   ;;  %s1331_s10 = sphi %s1356_s10, %s3522_s10   ;;  %s1327_s9 = sphi %s1354_s9, %s3521_s9  }
   0x3   : > { %p26_p1 = scmp.ge.s32.totalorder %s24_s12, 2  ;;  %p147_p2 = scmp.lt.s32.totalorder %s1335_s11, 3 }
   0x5   : > { %s3524_s12 = smov (%p26_p1, %s24_s12), 0  ;;  %p148_p3 = pnand %p1149_p0, %p147_p2 }
   0x7   : > { %151 = sbr.rel (%p148_p3) target bundleno = 473 (0x1d9), region = 28 }
   0xe   : > { %p180_p4 = scmp.lt.s32.totalorder %s1327_s9, 1  ;;  %v508_v8 = vlaneseq  ;;  %vm2944_vm0 = vcmask 1045504  }
  0x10   : > { %s3526_s9 = smov (!%p180_p4, %s1327_s9), 1  ;;  %v1406_v13 = vshrl.u32 %v508_v8, 7 }
  0x11   : > { %s1154_s13 = smul.u32 480, %s3526_s9  ;;  %s1151_s17 = sshll.u32 %s3526_s9, 2 }
  0x12   : > { %3020 = vst [vmem:[#allocation9_spill] sm:$0xff] %v1406_v13  ;;  %v1417_v18 = vadd.s32 8, %v1406_v13  ;;  %v1420_v19 = vadd.s32 16, %v1406_v13  ;;  %v1423_v20 = vadd.s32 24, %v1406_v13  ;;  %v1427_v22 = vadd.s32 32, %v1406_v13  ;;  %s196_s20 = scalar_lea.vmem %s2849_s1, %s1151_s17  ;;  %s200_s23 = scalar_lea.vmem %s2850_s2, %s3526_s9 }
  0x13   : > { %s1378_s16 = scalar_lea.vmem %s2848_s0, %s1154_s13  ;;  %v1430_v23 = vadd.s32 40, %v1406_v13  ;;  %v1439_v27 = vadd.s32 48, %v1406_v13  ;;  %v1442_v28 = vadd.s32 56, %v1406_v13  ;;  %v1445_v29 = vadd.s32 64, %v1406_v13 }
  0x14   : > { %v1381_v0 = vld [vmem:[%s1378_s16] sm:$0xff]  ;;  %v1384_v1 = vld [vmem:[%s1378_s16 + $0x8] sm:$0xff]  ;;  %v1387_v2 = vld [vmem:[%s1378_s16 + $0x10] sm:$0xff]  ;;  %v1448_v30 = vadd.s32 72, %v1406_v13  ;;  %v1452_v33 = vadd.s32 80, %v1406_v13  ;;  %v1455_v34 = vadd.s32 88, %v1406_v13 }
  0x15   : > { %3013 = vst [vmem:[#allocation2_spill] sm:$0xff] %v1381_v0  ;;  %3014 = vst [vmem:[#allocation3_spill] sm:$0xff] %v1384_v1  ;;  %v268_v3 = vsub.f32 1.0, %v1381_v0  ;;  %v269_v4 = vsub.f32 1.0, %v1384_v1  ;;  %v1392_v5 = vld [vmem:[%s1378_s16 + $0x18] sm:$0xff]  ;;  %v270_v6 = vsub.f32 1.0, %v1387_v2 }
  0x16   : > { %3015 = vst [vmem:[#allocation4_spill] sm:$0xff] %v1387_v2  ;;  %3016 = vst [vmem:[#allocation5_spill] sm:$0xff] %v1392_v5  ;;  %v1396_v7 = vld [vmem:[%s1378_s16 + $0x20] sm:$0xff]  ;;  %v271_v9 = vsub.f32 1.0, %v1392_v5  ;;  %v1400_v10 = vld [vmem:[%s1378_s16 + $0x28] sm:$0xff]  ;;  %v1467_v38 = vadd.s32 96, %v1406_v13 }
  0x17   : > { %3017 = vst [vmem:[#allocation6_spill] sm:$0xff] %v1396_v7  ;;  %1185 = vlog2.f32 %v268_v3  ;;  %3018 = vst [vmem:[#allocation7_spill] sm:$0xff] %v1400_v10  ;;  %v272_v11 = vsub.f32 1.0, %v1396_v7  ;;  %v1404_v12 = vld [vmem:[%s1378_s16 + $0x30] sm:$0xff]  ;;  %v273_v14 = vsub.f32 1.0, %v1400_v10  ;;  %v1410_v15 = vld [vmem:[%s1378_s16 + $0x38] sm:$0xff] }
  0x18   : > { %1187 = vlog2.f32 %v269_v4  ;;  %3019 = vst [vmem:[#allocation8_spill] sm:$0xff] %v1404_v12  ;;  %3021 = vst [vmem:[#allocation10_spill] sm:$0xff] %v1410_v15  ;;  %v274_v16 = vsub.f32 1.0, %v1404_v12  ;;  %v1414_v17 = vld [vmem:[%s1378_s16 + $0x40] sm:$0xff]  ;;  %v275_v21 = vsub.f32 1.0, %v1410_v15  ;;  %v1433_v25 = vld [vmem:[%s1378_s16 + $0x48] sm:$0xff] }
  0x19   : > { %1189 = vlog2.f32 %v270_v6  ;;  %3022 = vst [vmem:[#allocation11_spill] sm:$0xff] %v1414_v17  ;;  %3023 = vst [vmem:[#allocation12_spill] sm:$0xff] %v1433_v25  ;;  %v1436_v26 = vld [vmem:[%s1378_s16 + $0x50] sm:$0xff]  ;;  %v276_v32 = vsub.f32 1.0, %v1414_v17  ;;  %v1458_v35 = vld [vmem:[%s1378_s16 + $0x58] sm:$0xff]  ;;  %v1470_v39 = vadd.s32 104, %v1406_v13 }
  0x1a   : > { %1191 = vlog2.f32 %v271_v9  ;;  %3024 = vst [vmem:[#allocation13_spill] sm:$0xff] %v1436_v26  ;;  %3025 = vst [vmem:[#allocation14_spill] sm:$0xff] %v1458_v35  ;;  %v1461_v36 = vld [vmem:[%s1378_s16 + $0x60] sm:$0xff]  ;;  %v1464_v37 = vld [vmem:[%s1378_s16 + $0x68] sm:$0xff]  ;;  %v1473_v40 = vadd.s32 112, %v1406_v13  ;;  %v277_v44 = vsub.f32 1.0, %v1433_v25 }
  0x1b   : > { %1193 = vlog2.f32 %v272_v11  ;;  %3026 = vst [vmem:[#allocation15_spill] sm:$0xff] %v1461_v36  ;;  %3027 = vst [vmem:[#allocation16_spill] sm:$0xff] %v1464_v37  ;;  %v1476_v42 = vld [vmem:[%s1378_s16 + $0x70] sm:$0xff]  ;;  %v1479_v43 = vld [vmem:[%s1378_s16 + $0x78] sm:$0xff]  ;;  %v278_v45 = vsub.f32 1.0, %v1436_v26  ;;  %v1484_v46 = vadd.s32 1, %v1406_v13 }
  0x1c   : > { %1195 = vlog2.f32 %v273_v14  ;;  %3028 = vst [vmem:[#allocation17_spill] sm:$0xff] %v1473_v40  ;;  %3029 = vst [vmem:[#allocation18_spill] sm:$0xff] %v1476_v42  ;;  %v1487_v47 = vld [vmem:[%s1378_s16 + $0x80] sm:$0xff]  ;;  %v1490_v48 = vld [vmem:[%s1378_s16 + $0x88] sm:$0xff]  ;;  %v279_v52 = vsub.f32 1.0, %v1458_v35  ;;  %v280_v53 = vsub.f32 1.0, %v1461_v36 }
  0x1d   : > { %1197 = vlog2.f32 %v274_v16  ;;  %3030 = vst [vmem:[#allocation19_spill] sm:$0xff] %v1479_v43  ;;  %3031 = vst [vmem:[#allocation20_spill] sm:$0xff] %v1484_v46  ;;  %v281_v54 = vsub.f32 1.0, %v1464_v37  ;;  %v1500_v55 = vld [vmem:[%s1378_s16 + $0x90] sm:$0xff]  ;;  %v1503_v56 = vld [vmem:[%s1378_s16 + $0x98] sm:$0xff]  ;;  %v282_v58 = vsub.f32 1.0, %v1476_v42 }
  0x1e   : > { %1199 = vlog2.f32 %v275_v21  ;;  %3032 = vst [vmem:[#allocation21_spill] sm:$0xff] %v1487_v47  ;;  %3033 = vst [vmem:[#allocation22_spill] sm:$0xff] %v1490_v48  ;;  %v1506_v57 = vld [vmem:[%s1378_s16 + $0xa0] sm:$0xff]  ;;  %v1512_v61 = vld [vmem:[%s1378_s16 + $0xa8] sm:$0xff]  ;;  %v283_v62 = vsub.f32 1.0, %v1479_v43  ;;  %v284_v63 = vsub.f32 1.0, %v1487_v47 }
  0x1f   : > { %1201 = vlog2.f32 %v276_v32  ;;  %3036 = vst [vmem:[#allocation25_spill] sm:$0xff] %v1500_v55  ;;  %3037 = vst [vmem:[#allocation26_spill] sm:$0xff] %v1503_v56  ;;  %v285_v3 = vsub.f32 1.0, %v1490_v48  ;;  %v1518_v4 = vld [vmem:[%s1378_s16 + $0xb0] sm:$0xff]  ;;  %v1521_v6 = vld [vmem:[%s1378_s16 + $0xb8] sm:$0xff]  ;;  %v286_v21 = vsub.f32 1.0, %v1500_v55 }
  0x20   : > { %3038 = vst [vmem:[#allocation27_spill] sm:$0xff] %v1506_v57  ;;  %3040 = vst [vmem:[#allocation29_spill] sm:$0xff] %v1512_v61  ;;  %1203 = vlog2.f32 %v277_v44  ;;  %v1528_v16 = vld [vmem:[%s1378_s16 + $0xc0] sm:$0xff]  ;;  %v1534_v32 = vld [vmem:[%s1378_s16 + $0xc8] sm:$0xff]  ;;  %v3073_v15 = vsub.f32 1.0, %v1506_v57  ;;  %v3080_v12 = vsub.f32 1.0, %v1518_v4 }
  0x21   : > { %v1186_v24 = vpop.eup %1185  ;;  %3041 = vst [vmem:[#allocation30_spill] sm:$0xff] %v1518_v4  ;;  %3042 = vst [vmem:[#allocation31_spill] sm:$0xff] %v1521_v6  ;;  %1205 = vlog2.f32 %v278_v45  ;;  %v1540_v44 = vld [vmem:[%s1378_s16 + $0xd8] sm:$0xff]  ;;  %v1546_v48 = vld [vmem:[%s1378_s16 + $0xe0] sm:$0xff]  ;;  %v3087_v7 = vsub.f32 1.0, %v1528_v16 }
  0x22   : > { %v1188_v31 = vpop.eup %1187  ;;  %v1492_v49 = vmul.f32 0.6931472, %v1186_v24  ;;  %3044 = vst [vmem:[#allocation33_spill] sm:$0xff] %v1528_v16  ;;  %3045 = vst [vmem:[#allocation34_spill] sm:$0xff] %v1534_v32  ;;  %1207 = vlog2.f32 %v279_v52  ;;  %v1552_v24 = vld [vmem:[%s1378_s16 + $0xe8] sm:$0xff]  ;;  %v1555_v47 = vld [vmem:[%s1378_s16 + $0xf0] sm:$0xff] }
  0x23   : > { %v1190_v41 = vpop.eup %1189  ;;  %v1494_v50 = vmul.f32 0.6931472, %v1188_v31  ;;  %3047 = vst [vmem:[#allocation36_spill] sm:$0xff] %v1540_v44  ;;  %3049 = vst [vmem:[#allocation38_spill] sm:$0xff] %v1546_v48  ;;  %1209 = vlog2.f32 %v280_v53  ;;  %v1575_v43 = vld [vmem:[%s1378_s16 + $0x108] sm:$0xff]  ;;  %v1586_v35 = vld [vmem:[%s1378_s16 + $0x110] sm:$0xff] }
  0x24   : > { %3034 = vst [vmem:[#allocation23_spill] sm:$0xff] %v1492_v49  ;;  %v1192_v51 = vpop.eup %1191  ;;  %v1509_v59 = vmul.f32 0.6931472, %v1190_v41  ;;  %v1537_v41 = vld [vmem:[%s1378_s16 + $0xd0] sm:$0xff]  ;;  %3050 = vst [vmem:[#allocation39_spill] sm:$0xff] %v1552_v24  ;;  %v3053_v42 = vmax.f32 %v1492_v49, -100.0  ;;  %1211 = vlog2.f32 %v281_v54 }
  0x25   : > { %3035 = vst [vmem:[#allocation24_spill] sm:$0xff] %v1494_v50  ;;  %v1194_v60 = vpop.eup %1193  ;;  %v1523_v8 = vmul.f32 0.6931472, %v1192_v51  ;;  %3046 = vst [vmem:[#allocation35_spill] sm:$0xff] %v1537_v41  ;;  %v3054_v55 = vmax.f32 %v1494_v50, -100.0  ;;  %1213 = vlog2.f32 %v282_v58  ;;  %v1592_v54 = vld [vmem:[%s1378_s16 + $0x120] sm:$0xff] }
  0x26   : > { %3039 = vst [vmem:[#allocation28_spill] sm:$0xff] %v1509_v59  ;;  %v1196_v14 = vpop.eup %1195  ;;  %v1542_v51 = vmul.f32 0.6931472, %v1194_v60  ;;  %3051 = vst [vmem:[#allocation40_spill] sm:$0xff] %v1555_v47  ;;  %v1572_v60 = vld [vmem:[%s1378_s16 + $0x100] sm:$0xff]  ;;  %1215 = vlog2.f32 %v283_v62  ;;  %v1603_v26 = vld [vmem:[%s1378_s16 + $0x128] sm:$0xff] }
  0x27   : > { %3043 = vst [vmem:[#allocation32_spill] sm:$0xff] %v1523_v8  ;;  %v1198_v9 = vpop.eup %1197  ;;  %v1558_v11 = vmul.f32 0.6931472, %v1196_v14  ;;  %v951_v37 = vadd.f32 %v3054_v55, %v3053_v42  ;;  %v1569_v14 = vld [vmem:[%s1378_s16 + $0xf8] sm:$0xff]  ;;  %3056 = vst [vmem:[#allocation43_spill] sm:$0xff] %v1572_v60  ;;  %v3058_v55 = vmax.f32 %v1509_v59, -100.0  ;;  %1217 = vlog2.f32 %v284_v63 }
  0x28   : > { %3048 = vst [vmem:[#allocation37_spill] sm:$0xff] %v1542_v51  ;;  %v1200_v31 = vpop.eup %1199  ;;  %3055 = vst [vmem:[#allocation42_spill] sm:$0xff] %v1569_v14  ;;  %v1577_v49 = vmul.f32 0.6931472, %v1198_v9  ;;  %v1589_v9 = vld [vmem:[%s1378_s16 + $0x118] sm:$0xff]  ;;  %1219 = vlog2.f32 %v285_v3  ;;  %v1620_v25 = vld [vmem:[%s1378_s16 + $0x140] sm:$0xff] }
  0x29   : > { %3052 = vst [vmem:[#allocation41_spill] sm:$0xff] %v1558_v11  ;;  %v952_v36 = vadd.f32 %v951_v37, %v3058_v55  ;;  %v1202_v52 = vpop.eup %1201  ;;  %3059 = vst [vmem:[#allocation45_spill] sm:$0xff] %v1586_v35  ;;  %v1594_v42 = vmul.f32 0.6931472, %v1200_v31  ;;  %v3061_v55 = vmax.f32 %v1523_v8, -100.0  ;;  %v1606_v31 = vld [vmem:[%s1378_s16 + $0x130] sm:$0xff]  ;;  %1221 = vlog2.f32 %v286_v21 }
  0x2a   : > { %3057 = vst [vmem:[#allocation44_spill] sm:$0xff] %v1577_v49  ;;  %v1204_v53 = vpop.eup %1203  ;;  %3062 = vst [vmem:[#allocation47_spill] sm:$0xff] %v1603_v26  ;;  %v1609_v62 = vld [vmem:[%s1378_s16 + $0x138] sm:$0xff]  ;;  %v1611_v37 = vmul.f32 0.6931472, %v1202_v52  ;;  %v1623_v52 = vld [vmem:[%s1378_s16 + $0x148] sm:$0xff] }
  0x2b   : > { %3060 = vst [vmem:[#allocation46_spill] sm:$0xff] %v1594_v42  ;;  %v953_v50 = vadd.f32 %v952_v36, %v3061_v55  ;;  %3063 = vst [vmem:[#allocation48_spill] sm:$0xff] %v1606_v31  ;;  %v3066_v55 = vmax.f32 %v1542_v51, -100.0  ;;  %v1206_v58 = vpop.eup %1205  ;;  %v1626_v3 = vld [vmem:[%s1378_s16 + $0x150] sm:$0xff]  ;;  %v1628_v36 = vmul.f32 0.6931472, %v1204_v53 }
  0x2c   : > { %3064 = vst [vmem:[#allocation49_spill] sm:$0xff] %v1609_v62  ;;  %3065 = vst [vmem:[#allocation50_spill] sm:$0xff] %v1611_v37  ;;  %v3072_v63 = vmax.f32 %v1558_v11, -100.0  ;;  %v1208_v51 = vpop.eup %1207  ;;  %v1641_v53 = vld [vmem:[%s1378_s16 + $0x158] sm:$0xff]  ;;  %v3079_v17 = vmax.f32 %v1577_v49, -100.0  ;;  %v1668_v49 = vld [vmem:[%s1378_s16 + $0x180] sm:$0xff] }
  0x2d   : > { %v954_v59 = vadd.f32 %v953_v50, %v3066_v55  ;;  %3067 = vst [vmem:[#allocation51_spill] sm:$0xff] %v1620_v25  ;;  %3068 = vst [vmem:[#allocation52_spill] sm:$0xff] %v1623_v52  ;;  %v3071_v50 = vsub.f32 1.0, %v1503_v56  ;;  %v1647_v55 = vld [vmem:[%s1378_s16 + $0x168] sm:$0xff]  ;;  %v1210_v11 = vpop.eup %1209  ;;  %v1665_v21 = vld [vmem:[%s1378_s16 + $0x178] sm:$0xff]  ;;  %v3086_v57 = vmax.f32 %v1594_v42, -100.0 }
  0x2e   : > { %3069 = vst [vmem:[#allocation53_spill] sm:$0xff] %v1626_v3  ;;  %3070 = vst [vmem:[#allocation54_spill] sm:$0xff] %v1628_v36  ;;  %v1686_v56 = vld [vmem:[%s1378_s16 + $0x190] sm:$0xff]  ;;  %v1689_v42 = vld [vmem:[%s1378_s16 + $0x198] sm:$0xff]  ;;  %v3094_v2 = vsub.f32 1.0, %v1537_v41  ;;  %v3101_v0 = vsub.f32 1.0, %v1546_v48 }
  0x2f   : > { %1223 = vlog2.f32 %v3071_v50  ;;  %v955_v8 = vadd.f32 %v954_v59, %v3072_v63  ;;  %3074 = vst [vmem:[#allocation55_spill] sm:$0xff] %v1641_v53  ;;  %v1644_v50 = vld [vmem:[%s1378_s16 + $0x160] sm:$0xff]  ;;  %3076 = vst [vmem:[#allocation57_spill] sm:$0xff] %v1647_v55  ;;  %v1649_v59 = vmul.f32 0.6931472, %v1206_v58  ;;  %v3078_v63 = vsub.f32 1.0, %v1512_v61  ;;  %v1212_v58 = vpop.eup %1211 }
  0x30   : > { %1225 = vlog2.f32 %v3073_v15  ;;  %3075 = vst [vmem:[#allocation56_spill] sm:$0xff] %v1644_v50  ;;  %3082 = vst [vmem:[#allocation60_spill] sm:$0xff] %v1665_v21  ;;  %v3093_v61 = vmax.f32 %v1611_v37, -100.0  ;;  %v1710_v10 = vld [vmem:[%s1378_s16 + $0x1b0] sm:$0xff]  ;;  %v1756_v48 = vld [vmem:[%s1378_s16 + $0x1d8] sm:$0x3f] }
  0x31   : > { %3077 = vst [vmem:[#allocation58_spill] sm:$0xff] %v1649_v59  ;;  %1227 = vlog2.f32 %v3078_v63  ;;  %v956_v45 = vadd.f32 %v955_v8, %v3079_v17  ;;  %v1662_v63 = vld [vmem:[%s1378_s16 + $0x170] sm:$0xff]  ;;  %3083 = vst [vmem:[#allocation61_spill] sm:$0xff] %v1668_v49  ;;  %v1670_v17 = vmul.f32 0.6931472, %v1208_v51  ;;  %v3085_v8 = vsub.f32 1.0, %v1521_v6 }
  0x32   : > { %1229 = vlog2.f32 %v3080_v12  ;;  %3081 = vst [vmem:[#allocation59_spill] sm:$0xff] %v1662_v63  ;;  %v1214_v12 = vpop.eup %1213  ;;  %3089 = vst [vmem:[#allocation64_spill] sm:$0xff] %v1686_v56  ;;  %v3100_v6 = vmax.f32 %v1628_v36, -100.0  ;;  %v3106_v41 = vmax.f32 %v1649_v59, -100.0  ;;  %v1738_v36 = vld [vmem:[%s1378_s16 + $0x1c8] sm:$0x3f] }
  0x33   : > { %3084 = vst [vmem:[#allocation62_spill] sm:$0xff] %v1670_v17  ;;  %1231 = vlog2.f32 %v3085_v8  ;;  %v957_v15 = vadd.f32 %v956_v45, %v3086_v57  ;;  %v1216_v51 = vpop.eup %1215  ;;  %v1683_v8 = vld [vmem:[%s1378_s16 + $0x188] sm:$0xff]  ;;  %3090 = vst [vmem:[#allocation65_spill] sm:$0xff] %v1689_v42  ;;  %v1691_v57 = vmul.f32 0.6931472, %v1210_v11  ;;  %v3092_v45 = vsub.f32 1.0, %v1534_v32 }
  0x34   : > { %1233 = vlog2.f32 %v3087_v7  ;;  %3088 = vst [vmem:[#allocation63_spill] sm:$0xff] %v1683_v8  ;;  %v1218_v7 = vpop.eup %1217  ;;  %v1704_v32 = vld [vmem:[%s1378_s16 + $0x1a0] sm:$0xff]  ;;  %3097 = vst [vmem:[#allocation69_spill] sm:$0xff] %v1710_v10  ;;  %v1730_v5 = vmul.f32 0.6931472, %v1214_v12  ;;  %v3108_v12 = vsub.f32 1.0, %v1555_v47 }
  0x35   : > { %3091 = vst [vmem:[#allocation66_spill] sm:$0xff] %v1691_v57  ;;  %1235 = vlog2.f32 %v3092_v45  ;;  %v958_v4 = vadd.f32 %v957_v15, %v3093_v61  ;;  %v1220_v11 = vpop.eup %1219  ;;  %3095 = vst [vmem:[#allocation67_spill] sm:$0xff] %v1704_v32  ;;  %v1707_v45 = vld [vmem:[%s1378_s16 + $0x1a8] sm:$0xff]  ;;  %v1712_v61 = vmul.f32 0.6931472, %v1212_v58  ;;  %v3099_v15 = vsub.f32 1.0, %v1540_v44 }
  0x36   : > { %1237 = vlog2.f32 %v3094_v2  ;;  %3096 = vst [vmem:[#allocation68_spill] sm:$0xff] %v1707_v45  ;;  %v1222_v2 = vpop.eup %1221  ;;  %v1725_v44 = vld [vmem:[%s1378_s16 + $0x1b8] sm:$0xff]  ;;  %3104 = vst [vmem:[#allocation73_spill] sm:$0xff] %v1730_v5  ;;  %v1748_v13 = vmul.f32 0.6931472, %v1216_v51  ;;  %v3115_v51 = vsub.f32 1.0, %v1572_v60 }
  0x37   : > { %3098 = vst [vmem:[#allocation70_spill] sm:$0xff] %v1712_v61  ;;  %1239 = vlog2.f32 %v3099_v15  ;;  %v959_v16 = vadd.f32 %v958_v4, %v3100_v6  ;;  %3102 = vst [vmem:[#allocation71_spill] sm:$0xff] %v1725_v44  ;;  %v1728_v15 = vld [vmem:[%s1378_s16 + $0x1c0] sm:$0x3f]  ;;  %v3105_v4 = vsub.f32 1.0, %v1552_v24  ;;  %v3111_v6 = vsub.f32 1.0, %v1569_v14 }
  0x38   : > { %1241 = vlog2.f32 %v3101_v0  ;;  %3103 = vst [vmem:[#allocation72_spill] sm:$0xff] %v1728_v15  ;;  %3107 = vst [vmem:[#allocation74_spill] sm:$0xff] %v1738_v36  ;;  %v1760_v47 = vmul.f32 0.6931472, %v1218_v7  ;;  %v1773_v7 = vmul.f32 0.6931472, %v1222_v2 }
  0x39   : > { %v1224_v58 = vpop.eup %1223  ;;  %1243 = vlog2.f32 %v3105_v4  ;;  %v960_v1 = vadd.f32 %v959_v16, %v3106_v41  ;;  %v1746_v4 = vld [vmem:[%s1378_s16 + $0x1d0] sm:$0x3f]  ;;  %3110 = vst [vmem:[#allocation76_spill] sm:$0xff] %v1748_v13  ;;  %v3112_v41 = vmax.f32 %v1670_v17, -100.0  ;;  %3113 = vst [vmem:[#allocation77_spill] sm:$0xff] %v1756_v48  ;;  %v3116_v16 = vsub.f32 1.0, %v1575_v43 }
  0x3a   : > { %v1226_v37 = vpop.eup %1225  ;;  %1245 = vlog2.f32 %v3108_v12  ;;  %3109 = vst [vmem:[#allocation75_spill] sm:$0xff] %v1746_v4  ;;  %3114 = vst [vmem:[#allocation78_spill] sm:$0xff] %v1760_v47  ;;  %v1771_v12 = vmul.f32 0.6931472, %v1220_v11  ;;  %v1783_v46 = vmul.f32 0.6931472, %v1224_v58 }
  0x3b   : > { %v1228_v24 = vpop.eup %1227  ;;  %1247 = vlog2.f32 %v3111_v6  ;;  %v961_v0 = vadd.f32 %v960_v1, %v3112_v41  ;;  %v3117_v41 = vmax.f32 %v1691_v57, -100.0  ;;  %3119 = vst [vmem:[#allocation80_spill] sm:$0xff] %v1773_v7  ;;  %v3124_v11 = vsub.f32 1.0, %v1592_v54 }
  0x3c   : > { %v1230_v59 = vpop.eup %1229  ;;  %1249 = vlog2.f32 %v3115_v51  ;;  %3118 = vst [vmem:[#allocation79_spill] sm:$0xff] %v1771_v12  ;;  %v3120_v51 = vsub.f32 1.0, %v1586_v35  ;;  %3123 = vst [vmem:[#allocation81_spill] sm:$0xff] %v1783_v46  ;;  %v1791_v35 = vmul.f32 0.6931472, %v1226_v37  ;;  %v3127_v1 = vmax.f32 %v1730_v5, -100.0 }
  0x3d   : > { %v1232_v40 = vpop.eup %1231  ;;  %1251 = vlog2.f32 %v3116_v16  ;;  %v962_v17 = vadd.f32 %v961_v0, %v3117_v41  ;;  %v3121_v16 = vsub.f32 1.0, %v1589_v9  ;;  %v3122_v0 = vmax.f32 %v1712_v61, -100.0 }
  0x3e   : > { %v1234_v14 = vpop.eup %1233  ;;  %1253 = vlog2.f32 %v3120_v51  ;;  %v1789_v51 = vadd.s32 1, %v1417_v18  ;;  %3125 = vst [vmem:[#allocation82_spill] sm:$0xff] %v1791_v35  ;;  %v1798_v58 = vadd.s32 1, %v1420_v19  ;;  %v1805_v37 = vadd.s32 1, %v1423_v20 }
  0x3f   : > { %v1236_v60 = vpop.eup %1235  ;;  %1255 = vlog2.f32 %v3121_v16  ;;  %v963_v41 = vadd.f32 %v962_v17, %v3122_v0  ;;  %v3126_v16 = vsub.f32 1.0, %v1603_v26  ;;  %v1807_v26 = vmul.f32 0.6931472, %v1228_v24 }
  0x40   : > { %v1238_v57 = vpop.eup %1237  ;;  %1257 = vlog2.f32 %v3124_v11  ;;  %3128 = vst [vmem:[#allocation83_spill] sm:$0xff] %v1798_v58  ;;  %v3129_v11 = vsub.f32 1.0, %v1606_v31  ;;  %3130 = vst [vmem:[#allocation84_spill] sm:$0xff] %v1805_v37  ;;  %v3134_v19 = vmax.f32 %v1748_v13, -100.0  ;;  %v3136_v2 = vsub.f32 1.0, %v1620_v25 }
  0x41   : > { %v1240_v6 = vpop.eup %1239  ;;  %1259 = vlog2.f32 %v3126_v16  ;;  %v964_v17 = vadd.f32 %v963_v41, %v3127_v1  ;;  %3131 = vst [vmem:[#allocation85_spill] sm:$0xff] %v1807_v26  ;;  %v1809_v16 = vmul.f32 0.6931472, %v1230_v59  ;;  %v3133_v1 = vsub.f32 1.0, %v1609_v62 }
  0x42   : > { %v1242_v0 = vpop.eup %1241  ;;  %1261 = vlog2.f32 %v3129_v11  ;;  %v1815_v11 = vmul.f32 0.6931472, %v1232_v40  ;;  %v1821_v18 = vadd.s32 1, %v1427_v22  ;;  %v1823_v59 = vmul.f32 0.6931472, %v1234_v14 }
  0x43   : > { %v1244_v61 = vpop.eup %1243  ;;  %3132 = vst [vmem:[#allocation86_spill] sm:$0xff] %v1809_v16  ;;  %1263 = vlog2.f32 %v3133_v1  ;;  %v965_v41 = vadd.f32 %v964_v17, %v3134_v19  ;;  %v3139_v62 = vsub.f32 1.0, %v1623_v52  ;;  %v3140_v17 = vmax.f32 %v1760_v47, -100.0 }
  0x44   : > { %v1246_v5 = vpop.eup %1245  ;;  %3135 = vst [vmem:[#allocation87_spill] sm:$0xff] %v1815_v11  ;;  %1265 = vlog2.f32 %v3136_v2  ;;  %3137 = vst [vmem:[#allocation88_spill] sm:$0xff] %v1821_v18  ;;  %v1830_v13 = vmul.f32 0.6931472, %v1236_v60  ;;  %v1832_v2 = vmul.f32 0.6931472, %v1238_v57 }
  0x45   : > { %v1248_v24 = vpop.eup %1247  ;;  %3138 = vst [vmem:[#allocation89_spill] sm:$0xff] %v1823_v59  ;;  %1267 = vlog2.f32 %v3139_v62  ;;  %v966_v40 = vadd.f32 %v965_v41, %v3140_v17  ;;  %v3143_v20 = vsub.f32 1.0, %v1626_v3  ;;  %v1837_v22 = vadd.s32 1, %v1430_v23 }
  0x46   : > { %v1250_v19 = vpop.eup %1249  ;;  %3141 = vst [vmem:[#allocation90_spill] sm:$0xff] %v1830_v13  ;;  %3142 = vst [vmem:[#allocation91_spill] sm:$0xff] %v1832_v2  ;;  %v3144_v52 = vsub.f32 1.0, %v1641_v53  ;;  %v3145_v41 = vmax.f32 %v1771_v12, -100.0  ;;  %v1845_v57 = vmul.f32 0.6931472, %v1240_v6 }
  0x47   : > { %1269 = vlog2.f32 %v3143_v20  ;;  %v1252_v14 = vpop.eup %1251  ;;  %v3147_v47 = vsub.f32 1.0, %v1644_v50  ;;  %v1851_v20 = vadd.s32 1, %v1439_v27  ;;  %v3149_v62 = vsub.f32 1.0, %v1647_v55 }
  0x48   : > { %1271 = vlog2.f32 %v3144_v52  ;;  %v967_v60 = vadd.f32 %v966_v40, %v3145_v41  ;;  %v1254_v17 = vpop.eup %1253  ;;  %3146 = vst [vmem:[#allocation92_spill] sm:$0xff] %v1845_v57  ;;  %v1853_v52 = vmul.f32 0.6931472, %v1242_v0  ;;  %v3150_v40 = vmax.f32 %v1773_v7, -100.0 }
  0x49   : > { %1273 = vlog2.f32 %v3147_v47  ;;  %v1256_v53 = vpop.eup %1255  ;;  %v3151_v12 = vsub.f32 1.0, %v1662_v63  ;;  %v1865_v23 = vadd.s32 1, %v1442_v28  ;;  %v1867_v50 = vmul.f32 0.6931472, %v1244_v61 }
  0x4a   : > { %3148 = vst [vmem:[#allocation93_spill] sm:$0xff] %v1853_v52  ;;  %1275 = vlog2.f32 %v3149_v62  ;;  %v968_v6 = vadd.f32 %v967_v60, %v3150_v40  ;;  %v1258_v41 = vpop.eup %1257  ;;  %v1869_v62 = vmul.f32 0.6931472, %v1246_v5  ;;  %v3154_v1 = vsub.f32 1.0, %v1665_v21 }
  0x4b   : > { %1277 = vlog2.f32 %v3151_v12  ;;  %v1260_v0 = vpop.eup %1259  ;;  %3152 = vst [vmem:[#allocation94_spill] sm:$0xff] %v1867_v50  ;;  %v3155_v60 = vmax.f32 %v1783_v46, -100.0  ;;  %v1875_v12 = vmul.f32 0.6931472, %v1248_v24  ;;  %v3157_v47 = vsub.f32 1.0, %v1668_v49 }
  0x4c   : > { %3153 = vst [vmem:[#allocation95_spill] sm:$0xff] %v1869_v62  ;;  %1279 = vlog2.f32 %v3154_v1  ;;  %v1262_v7 = vpop.eup %1261  ;;  %v1881_v27 = vadd.s32 1, %v1445_v29  ;;  %v1883_v5 = vmul.f32 0.6931472, %v1250_v19  ;;  %v3159_v21 = vsub.f32 1.0, %v1683_v8 }
  0x4d   : > { %v969_v40 = vadd.f32 %v968_v6, %v3155_v60  ;;  %3156 = vst [vmem:[#allocation96_spill] sm:$0xff] %v1875_v12  ;;  %1281 = vlog2.f32 %v3157_v47  ;;  %v1264_v61 = vpop.eup %1263  ;;  %v3160_v6 = vmax.f32 %v1791_v35, -100.0  ;;  %v1890_v46 = vmul.f32 0.6931472, %v1252_v14 }
  0x4e   : > { %3158 = vst [vmem:[#allocation97_spill] sm:$0xff] %v1883_v5  ;;  %1283 = vlog2.f32 %v3159_v21  ;;  %v1266_v60 = vpop.eup %1265  ;;  %v1892_v47 = vmul.f32 0.6931472, %v1254_v17  ;;  %v3163_v28 = vsub.f32 1.0, %v1686_v56  ;;  %v1897_v29 = vadd.s32 1, %v1448_v30 }
  0x4f   : > { %v970_v24 = vadd.f32 %v969_v40, %v3160_v6  ;;  %3161 = vst [vmem:[#allocation98_spill] sm:$0xff] %v1890_v46  ;;  %v1268_v19 = vpop.eup %1267  ;;  %v3164_v8 = vsub.f32 1.0, %v1689_v42  ;;  %v3165_v40 = vmax.f32 %v1807_v26, -100.0  ;;  %v1905_v6 = vmul.f32 0.6931472, %v1256_v53 }
  0x50   : > { %3162 = vst [vmem:[#allocation99_spill] sm:$0xff] %v1892_v47  ;;  %1285 = vlog2.f32 %v3163_v28  ;;  %v3167_v28 = vsub.f32 1.0, %v1704_v32  ;;  %v1911_v35 = vadd.s32 1, %v1452_v33  ;;  %v1913_v42 = vmul.f32 0.6931472, %v1258_v41 }
  0x51   : > { %1287 = vlog2.f32 %v3164_v8  ;;  %v971_v14 = vadd.f32 %v970_v24, %v3165_v40  ;;  %v1270_v17 = vpop.eup %1269  ;;  %3166 = vst [vmem:[#allocation100_spill] sm:$0xff] %v1905_v6  ;;  %v3169_v1 = vsub.f32 1.0, %v1707_v45  ;;  %v3170_v24 = vmax.f32 %v1809_v16, -100.0 }
  0x52   : > { %1289 = vlog2.f32 %v3167_v28  ;;  %v1272_v8 = vpop.eup %1271  ;;  %3168 = vst [vmem:[#allocation101_spill] sm:$0xff] %v1913_v42  ;;  %v3171_v26 = vsub.f32 1.0, %v1710_v10  ;;  %v1926_v41 = vadd.s32 1, %v1455_v34  ;;  %v1928_v45 = vmul.f32 0.6931472, %v1260_v0 }
  0x53   : > { %1291 = vlog2.f32 %v3169_v1  ;;  %v972_v53 = vadd.f32 %v971_v14, %v3170_v24  ;;  %v1274_v40 = vpop.eup %1273  ;;  %v3173_v1 = vsub.f32 1.0, %v1725_v44  ;;  %v3174_v14 = vmax.f32 %v1815_v11, -100.0 }
  0x54   : > { %1293 = vlog2.f32 %v3171_v26  ;;  %v1276_v30 = vpop.eup %1275  ;;  %3172 = vst [vmem:[#allocation102_spill] sm:$0xff] %v1928_v45  ;;  %v1935_v21 = vadd.s32 1, %v1467_v38  ;;  %v1937_v28 = vmul.f32 0.6931472, %v1262_v7  ;;  %v1939_v33 = vmul.f32 0.6931472, %v1264_v61 }
  0x55   : > { %1295 = vlog2.f32 %v3173_v1  ;;  %v973_v24 = vadd.f32 %v972_v53, %v3174_v14  ;;  %v1278_v26 = vpop.eup %1277  ;;  %v3178_v34 = vsub.f32 1.0, %v1728_v15  ;;  %v1944_v10 = vmul.f32 0.6931472, %v1266_v60 }
  0x56   : > { %3175 = vst [vmem:[#allocation103_spill] sm:$0xff] %v1935_v21  ;;  %3176 = vst [vmem:[#allocation104_spill] sm:$0xff] %v1937_v28  ;;  %v1280_v16 = vpop.eup %1279  ;;  %v3179_v1 = vsub.f32 1.0, %v1738_v36  ;;  %v3180_v38 = vmax.f32 %v1823_v59, -100.0  ;;  %v1954_v61 = vmul.f32 0.6931472, %v1268_v19 }
  0x57   : > { %3177 = vst [vmem:[#allocation105_spill] sm:$0xff] %v1939_v33  ;;  %1297 = vlog2.f32 %v3178_v34  ;;  %v1282_v7 = vpop.eup %1281  ;;  %v1956_v34 = vmul.f32 0.6931472, %v1270_v17  ;;  %v3181_v60 = vsub.f32 1.0, %v1746_v4  ;;  %v1961_v0 = vadd.s32 1, %v1470_v39  ;;  %v3186_v39 = vld [vmem:[#allocation17_spill] sm:$0xff] }
  0x58   : > { %1299 = vlog2.f32 %v3179_v1  ;;  %v974_v14 = vadd.f32 %v973_v24, %v3180_v38  ;;  %v1284_v1 = vpop.eup %1283  ;;  %v1963_v53 = vmul.f32 0.6931472, %v1272_v8  ;;  %v3183_v24 = vsub.f32 1.0, %v1756_v48  ;;  %v3188_v8 = vld [vmem:[#allocation9_spill] sm:$0xff] }
  0x59   : > { %1301 = vlog2.f32 %v3181_v60  ;;  %3182 = vst [vmem:[#allocation106_spill] sm:$0xff] %v1961_v0  ;;  %v3184_v59 = vmax.f32 %v1830_v13, -100.0  ;;  %v1972_v60 = vld [vmem:[%s196_s20] sm:$0xf]  ;;  %v1975_v32 = vadd.s32 1, %v3186_v39  ;;  %v3196_v39 = vsub.s32 0, %v3188_v8 }
  0x5a   : > { %1303 = vlog2.f32 %v3183_v24  ;;  %v1286_v11 = vpop.eup %1285  ;;  %3185 = vst [vmem:[#allocation107_spill] sm:$0xff] %v1972_v60  ;;  %v1978_v48 = vmul.f32 0.6931472, %v1274_v40  ;;  %v1980_v24 = vmul.f32 0.6931472, %v1276_v30  ;;  %v3192_v40 = vmax.f32 %v1845_v57, -100.0 }
  0x5b   : > { %v975_v19 = vadd.f32 %v974_v14, %v3184_v59  ;;  %3187 = vst [vmem:[#allocation17_spill] sm:$0xff] %v1975_v32  ;;  %v1288_v36 = vpop.eup %1287  ;;  %v3190_v59 = vmax.f32 %v1832_v2, -100.0  ;;  %v1989_v56 = vmul.f32 0.6931472, %v1278_v26  ;;  %v1997_v44 = vmul.f32 0.6931472, %v1282_v7 }
  0x5c   : > { %3189 = vst [vmem:[#allocation108_spill] sm:$0xff] %v1980_v24  ;;  %v1290_v17 = vpop.eup %1289  ;;  %v1999_v13 = vmul.f32 0.6931472, %v1284_v1  ;;  %v2004_v15 = vrot.slane %v1972_v60, %v3196_v39  ;;  %v2006_v49 = vmul.f32 0.6931472, %v1286_v11  ;;  %v3201_v57 = vsub.s32 1, %v3188_v8 }
  0x5d   : > { %v976_v14 = vadd.f32 %v975_v19, %v3190_v59  ;;  %v1292_v4 = vpop.eup %1291  ;;  %3191 = vst [vmem:[#allocation109_spill] sm:$0xff] %v1989_v56  ;;  %v1995_v59 = vmul.f32 0.6931472, %v1280_v16  ;;  %3194 = vst [vmem:[#allocation111_spill] sm:$0xff] %v1997_v44  ;;  %v2012_v7 = vmul.f32 0.6931472, %v1288_v36 }
  0x5e   : > { %v1294_v19 = vpop.eup %1293  ;;  %3195 = vst [vmem:[#allocation112_spill] sm:$0xff] %v1999_v13  ;;  %3197 = vst [vmem:[#allocation113_spill] sm:$0xff] %v2006_v49  ;;  %v2014_v1 = vmul.f32 0.6931472, %v1290_v17  ;;  %v2019_v39 = vrot.slane %v1972_v60, %v3201_v57  ;;  %v3202_v11 = vsub.s32 2, %v3188_v8  ;;  %v3204_v36 = vmax.f32 %v1867_v50, -100.0 }
  0x5f   : > { %v977_v38 = vadd.f32 %v976_v14, %v3192_v40  ;;  %3193 = vst [vmem:[#allocation110_spill] sm:$0xff] %v1995_v59  ;;  %v1296_v26 = vpop.eup %1295  ;;  %v3198_v40 = vmax.f32 %v1853_v52, -100.0  ;;  %3199 = vst [vmem:[#allocation114_spill] sm:$0xff] %v2012_v7  ;;  %v2026_v63 = vmul.f32 0.6931472, %v1292_v4  ;;  %vm2958_vm5 = vcmp.eq.s32.totalorder %v2004_v15, %v1789_v51  ;;  %v3225_v4 = vld [vmem:[#allocation3_spill] sm:$0xff] }
  0x60   : > { %3200 = vst [vmem:[#allocation115_spill] sm:$0xff] %v2014_v1  ;;  %v2024_v30 = vrot.slane %v1972_v60, %v3202_v11  ;;  %v2036_v55 = vmul.f32 0.6931472, %v1294_v19  ;;  %v2041_v31 = vmul.f32 0.6931472, %v1296_v26  ;;  %vm2957_vm6 = vcmp.eq.s32.totalorder %v2019_v39, %v1789_v51 }
  0x61   : > { %v978_v16 = vadd.f32 %v977_v38, %v3198_v40  ;;  %v1298_v2 = vpop.eup %1297  ;;  %3203 = vst [vmem:[#allocation116_spill] sm:$0xff] %v2026_v63  ;;  %v3205_v40 = vsub.s32 3, %v3188_v8  ;;  %v3211_v8 = vld [vmem:[#allocation20_spill] sm:$0xff]  ;;  %vm2963_vm9 = vcmp.eq.s32.totalorder %v2004_v15, %v1798_v58  ;;  %v3216_v3 = vmax.f32 %v1890_v46, -100.0  ;;  %v3238_v46 = vld [vmem:[#allocation14_spill] sm:$0xff] }
  0x62   : > { %v1300_v14 = vpop.eup %1299  ;;  %3206 = vst [vmem:[#allocation117_spill] sm:$0xff] %v2036_v55  ;;  %3207 = vst [vmem:[#allocation118_spill] sm:$0xff] %v2041_v31  ;;  %v2043_v38 = vmul.f32 0.6931472, %v1298_v2  ;;  %vm2968_vm1 = vcmp.eq.s32.totalorder %v2004_v15, %v3211_v8  ;;  %vm2966_vm2 = vcmp.eq.s32.totalorder %v2019_v39, %v3211_v8  ;;  %vm2954_vm3 = vcmp.eq.s32.totalorder %v2024_v30, %v3211_v8 }
  0x63   : > { %v979_v17 = vadd.f32 %v978_v16, %v3204_v36  ;;  %v2034_v52 = vrot.slane %v1972_v60, %v3205_v40  ;;  %v1302_v57 = vpop.eup %1301  ;;  %v3209_v36 = vmax.f32 %v1869_v62, -100.0  ;;  %v2048_v60 = vmul.f32 0.6931472, %v1300_v14 }
  0x64   : > { %v1304_v25 = vpop.eup %1303  ;;  %3208 = vst [vmem:[#allocation119_spill] sm:$0xff] %v2043_v38  ;;  %v2058_v2 = vmul.f32 0.6931472, %v1302_v57  ;;  %v3213_v14 = vmax.f32 %v1875_v12, -100.0  ;;  %vm2956_vm7 = vcmp.eq.s32.totalorder %v2024_v30, %v1789_v51  ;;  %vm2981_vm12 = vcmp.eq.s32.totalorder %v2004_v15, %v1837_v22  ;;  %v3242_v12 = vld [vmem:[#allocation16_spill] sm:$0xff] }
  0x65   : > { %v980_v40 = vadd.f32 %v979_v17, %v3209_v36  ;;  %3210 = vst [vmem:[#allocation120_spill] sm:$0xff] %v2048_v60  ;;  %vm2953_vm4 = vcmp.eq.s32.totalorder %v2034_v52, %v3211_v8  ;;  %v2069_v36 = vmul.f32 0.6931472, %v1304_v25  ;;  %vm2961_vm8 = vcmp.eq.s32.totalorder %v2034_v52, %v1789_v51 }
  0x66   : > { %3212 = vst [vmem:[#allocation20_spill] sm:$0xff] %v2058_v2  ;;  %v2943_v25 = vmax.f32 %v2048_v60, -100.0  ;;  %v2946_v57 = vmax.f32 %v2058_v2, -100.0  ;;  %vm2982_vm15 = vcmp.eq.s32.totalorder %v2034_v52, %v1837_v22  ;;  %vm2984_vm14 = vcmp.eq.s32.totalorder %v2004_v15, %v1851_v20  ;;  %v3228_v60 = vld [vmem:[#allocation6_spill] sm:$0xff] }
  0x67   : > { %v981_v17 = vadd.f32 %v980_v40, %v3213_v14  ;;  %3214 = vst [vmem:[#allocation121_spill] sm:$0xff] %v2069_v36  ;;  %v2942_v40 = vmax.f32 %v2043_v38, -100.0  ;;  %v3215_v14 = vmax.f32 %v1883_v5, -100.0  ;;  %vm2983_vm11 = vcmp.eq.s32.totalorder %v2019_v39, %v1851_v20  ;;  %v3229_v38 = vld [vmem:[#allocation7_spill] sm:$0xff] }
  0x68   : > { %v2103_v16 = vsel %vm2944_vm0, %v2943_v25, 0.0  ;;  %vm2985_vm10 = vcmp.eq.s32.totalorder %v2024_v30, %v1851_v20  ;;  %v616_v11 = vsel %vm2966_vm2, %v3225_v4, 0.0  ;;  %vm2986_vm13 = vcmp.eq.s32.totalorder %v2019_v39, %v1865_v23  ;;  %v3240_v5 = vld [vmem:[#allocation15_spill] sm:$0xff] }
  0x69   : > { %v982_v26 = vadd.f32 %v981_v17, %v3215_v14  ;;  %v2095_v17 = vsel %vm2944_vm0, %v2942_v40, 0.0  ;;  %v2945_v14 = vmax.f32 %v2069_v36, -100.0  ;;  %3218 = vst [vmem:[#allocation123_spill] sm:$0xff] %v2103_v16  ;;  %v2114_v40 = vsel %vm2944_vm0, %v2946_v57, 0.0  ;;  %v3226_v36 = vld [vmem:[#allocation4_spill] sm:$0xff]  ;;  %v3253_v16 = vld [vmem:[#allocation25_spill] sm:$0xff] }
  0x6a   : > { %3217 = vst [vmem:[#allocation122_spill] sm:$0xff] %v2095_v17  ;;  %3220 = vst [vmem:[#allocation124_spill] sm:$0xff] %v2114_v40  ;;  %v620_v4 = vsel %vm2957_vm6, %v3229_v38, 0.0  ;;  %v3233_v38 = vld [vmem:[#allocation11_spill] sm:$0xff]  ;;  %vm2990_vm6 = vcmp.eq.s32.totalorder %v2004_v15, %v1881_v27  ;;  %v3244_v62 = vmax.f32 %v1937_v28, -100.0  ;;  %vm3252_vm2 = vcmp.eq.s32.totalorder %v2019_v39, %v1821_v18  ;;  %v3255_v17 = vld [vmem:[#allocation26_spill] sm:$0xff] }
  0x6b   : > { %v983_v19 = vadd.f32 %v982_v26, %v3216_v3  ;;  %v3219_v3 = vmax.f32 %v1892_v47, -100.0  ;;  %v2123_v25 = vsel %vm2944_vm0, %v2945_v14, 0.0  ;;  %vm2987_vm0 = vcmp.eq.s32.totalorder %v2004_v15, %v1865_v23  ;;  %v3224_v14 = vld [vmem:[#allocation2_spill] sm:$0xff] }
  0x6c   : > { %3221 = vst [vmem:[#allocation125_spill] sm:$0xff] %v2123_v25  ;;  %v615_v57 = vsel %vm2968_vm1, %v3224_v14, 0.0  ;;  %v619_v14 = vsel %vm2958_vm5, %v3228_v60, 0.0  ;;  %v3232_v60 = vld [vmem:[#allocation10_spill] sm:$0xff]  ;;  %v623_v47 = vsel %vm2963_vm9, %v3233_v38, 0.0  ;;  %vm3237_vm5 = vcmp.eq.s32.totalorder %v2024_v30, %v1798_v58 }
  0x6d   : > { %v984_v26 = vadd.f32 %v983_v19, %v3219_v3  ;;  %v3222_v19 = vmax.f32 %v1905_v6, -100.0  ;;  %v3231_v6 = vmax.f32 %v1928_v45, -100.0  ;;  %vm3241_vm9 = vcmp.eq.s32.totalorder %v2004_v15, %v1805_v37 }
  0x6e   : > { %v627_v38 = vsel %vm3241_vm9, %v3240_v5, 0.0  ;;  %v3247_v5 = vld [vmem:[#allocation19_spill] sm:$0xff]  ;;  %vm3248_vm9 = vcmp.eq.s32.totalorder %v2034_v52, %v1805_v37  ;;  %vm2992_vm1 = vcmp.eq.s32.totalorder %v2034_v52, %v1881_v27  ;;  %v675_v31 = vadd.f32 %v619_v14, %v615_v57  ;;  %v3259_v57 = vld [vmem:[#allocation29_spill] sm:$0xff] }
  0x6f   : > { %v985_v3 = vadd.f32 %v984_v26, %v3222_v19  ;;  %v3223_v26 = vmax.f32 %v1913_v42, -100.0  ;;  %v3230_v42 = vld [vmem:[#allocation8_spill] sm:$0xff]  ;;  %v630_v50 = vsel %vm3248_vm9, %v3247_v5, 0.0  ;;  %vm3256_vm9 = vcmp.eq.s32.totalorder %v2034_v52, %v1821_v18 }
  0x70   : > { %v634_v5 = vsel %vm3256_vm9, %v3255_v17, 0.0  ;;  %v697_v55 = vadd.f32 %v620_v4, %v616_v11  ;;  %vm3260_vm9 = vcmp.eq.s32.totalorder %v2019_v39, %v1837_v22  ;;  %v3261_v17 = vld [vmem:[#allocation30_spill] sm:$0xff]  ;;  %v3264_v11 = vld [vmem:[#allocation31_spill] sm:$0xff] }
  0x71   : > { %v986_v19 = vadd.f32 %v985_v3, %v3223_v26  ;;  %v617_v3 = vsel %vm2954_vm3, %v3226_v36, 0.0  ;;  %v3227_v26 = vld [vmem:[#allocation5_spill] sm:$0xff]  ;;  %v621_v36 = vsel %vm2956_vm7, %v3230_v42, 0.0  ;;  %vm2988_vm3 = vcmp.eq.s32.totalorder %v2034_v52, %v1865_v23  ;;  %v3234_v42 = vld [vmem:[#allocation12_spill] sm:$0xff] }
  0x72   : > { %v618_v2 = vsel %vm2953_vm4, %v3227_v26, 0.0  ;;  %vm2989_vm4 = vcmp.eq.s32.totalorder %v2024_v30, %v1865_v23  ;;  %v622_v26 = vsel %vm2961_vm8, %v3232_v60, 0.0  ;;  %vm3235_vm7 = vcmp.eq.s32.totalorder %v2019_v39, %v1798_v58 }
  0x73   : > { %v987_v25 = vadd.f32 %v986_v19, %v3231_v6  ;;  %v624_v6 = vsel %vm3235_vm7, %v3234_v42, 0.0  ;;  %v3236_v19 = vld [vmem:[#allocation13_spill] sm:$0xff]  ;;  %vm3239_vm8 = vcmp.eq.s32.totalorder %v2034_v52, %v1798_v58  ;;  %vm3243_vm7 = vcmp.eq.s32.totalorder %v2019_v39, %v1805_v37 }
  0x74   : > { %v625_v45 = vsel %vm3237_vm5, %v3236_v19, 0.0  ;;  %v626_v60 = vsel %vm3239_vm8, %v3238_v46, 0.0  ;;  %v628_v42 = vsel %vm3243_vm7, %v3242_v12, 0.0  ;;  %vm2991_vm5 = vcmp.eq.s32.totalorder %v2019_v39, %v1881_v27  ;;  %v3245_v46 = vld [vmem:[#allocation18_spill] sm:$0xff]  ;;  %v3249_v12 = vld [vmem:[#allocation21_spill] sm:$0xff] }
  0x75   : > { %v988_v40 = vadd.f32 %v987_v25, %v3244_v62  ;;  %vm3246_vm8 = vcmp.eq.s32.totalorder %v2024_v30, %v1805_v37  ;;  %vm3250_vm7 = vcmp.eq.s32.totalorder %v2004_v15, %v1821_v18  ;;  %v3251_v25 = vld [vmem:[#allocation22_spill] sm:$0xff]  ;;  %v718_v58 = vadd.f32 %v621_v36, %v617_v3 }
  0x76   : > { %v629_v19 = vsel %vm3246_vm8, %v3245_v46, 0.0  ;;  %v631_v62 = vsel %vm3250_vm7, %v3249_v12, 0.0  ;;  %v632_v28 = vsel %vm3252_vm2, %v3251_v25, 0.0  ;;  %vm3254_vm8 = vcmp.eq.s32.totalorder %v2024_v30, %v1821_v18  ;;  %v3258_v25 = vld [vmem:[#allocation27_spill] sm:$0xff] }
  0x77   : > { %v633_v46 = vsel %vm3254_vm8, %v3253_v16, 0.0  ;;  %v3257_v12 = vmax.f32 %v1939_v33, -100.0  ;;  %vm2993_vm2 = vcmp.eq.s32.totalorder %v2019_v39, %v1897_v29  ;;  %v635_v16 = vsel %vm2981_vm12, %v3258_v25, 0.0 }
  0x78   : > { %vm3262_vm7 = vcmp.eq.s32.totalorder %v2024_v30, %v1837_v22  ;;  %v739_v33 = vadd.f32 %v622_v26, %v618_v2  ;;  %v3263_v18 = vmax.f32 %v1944_v10, -100.0  ;;  %vm594_vm12 = vcmp.eq.s32.totalorder %v2034_v52, %v1897_v29 }
  0x79   : > { %v989_v37 = vadd.f32 %v988_v40, %v3257_v12  ;;  %v636_v40 = vsel %vm3260_vm9, %v3259_v57, 0.0  ;;  %v637_v14 = vsel %vm3262_vm7, %v3261_v17, 0.0  ;;  %v676_v12 = vadd.f32 %v675_v31, %v623_v47  ;;  %v3265_v31 = vld [vmem:[#allocation33_spill] sm:$0xff] }
  0x7a   : > { %vm595_vm8 = vcmp.eq.s32.totalorder %v2004_v15, %v1911_v35  ;;  %v638_v3 = vsel %vm2982_vm15, %v3264_v11, 0.0  ;;  %v698_v4 = vadd.f32 %v697_v55, %v624_v6  ;;  %v719_v36 = vadd.f32 %v718_v58, %v625_v45  ;;  %v3268_v55 = vld [vmem:[#allocation35_spill] sm:$0xff] }
  0x7b   : > { %v990_v25 = vadd.f32 %v989_v37, %v3263_v18  ;;  %vm596_vm7 = vcmp.eq.s32.totalorder %v2019_v39, %v1911_v35  ;;  %v639_v18 = vsel %vm2984_vm14, %v3265_v31, 0.0  ;;  %v3266_v37 = vld [vmem:[#allocation34_spill] sm:$0xff]  ;;  %v677_v2 = vadd.f32 %v676_v12, %v627_v38 }
  0x7c   : > { %v640_v47 = vsel %vm2983_vm11, %v3266_v37, 0.0  ;;  %v740_v26 = vadd.f32 %v739_v33, %v626_v60  ;;  %v3267_v57 = vmax.f32 %v1954_v61, -100.0  ;;  %vm597_vm9 = vcmp.eq.s32.totalorder %v2024_v30, %v1911_v35  ;;  %v3269_v33 = vld [vmem:[#allocation36_spill] sm:$0xff]  ;;  %v3271_v38 = vld [vmem:[#allocation38_spill] sm:$0xff] }
  0x7d   : > { %vm598_vm15 = vcmp.eq.s32.totalorder %v2034_v52, %v1911_v35  ;;  %v641_v45 = vsel %vm2985_vm10, %v3268_v55, 0.0  ;;  %v699_v58 = vadd.f32 %v698_v4, %v628_v42  ;;  %v720_v6 = vadd.f32 %v719_v36, %v629_v19  ;;  %v3273_v42 = vld [vmem:[#allocation39_spill] sm:$0xff] }
  0x7e   : > { %v991_v17 = vadd.f32 %v990_v25, %v3267_v57  ;;  %vm3270_vm14 = vcmp.eq.s32.totalorder %v2034_v52, %v1851_v20  ;;  %v643_v12 = vsel %vm2987_vm0, %v3271_v38, 0.0  ;;  %v678_v25 = vadd.f32 %v677_v2, %v631_v62  ;;  %v3275_v2 = vld [vmem:[#allocation42_spill] sm:$0xff] }
  0x7f   : > { %v642_v60 = vsel %vm3270_vm14, %v3269_v33, 0.0  ;;  %v741_v11 = vadd.f32 %v740_v26, %v630_v50  ;;  %v3272_v31 = vmax.f32 %v1956_v34, -100.0  ;;  %vm600_vm10 = vcmp.eq.s32.totalorder %v2019_v39, %v1926_v41  ;;  %v3274_v50 = vld [vmem:[#allocation40_spill] sm:$0xff] }
  0x80   : > { %vm601_vm11 = vcmp.eq.s32.totalorder %v2024_v30, %v1926_v41  ;;  %v644_v19 = vsel %vm2986_vm13, %v3273_v42, 0.0  ;;  %v700_v4 = vadd.f32 %v699_v58, %v632_v28  ;;  %v721_v36 = vadd.f32 %v720_v6, %v633_v46  ;;  %v3277_v28 = vld [vmem:[#allocation43_spill] sm:$0xff] }
  0x81   : > { %v992_v37 = vadd.f32 %v991_v17, %v3272_v31  ;;  %vm2994_vm14 = vcmp.eq.s32.totalorder %v2034_v52, %v1926_v41  ;;  %v645_v62 = vsel %vm2989_vm4, %v3274_v50, 0.0  ;;  %v646_v26 = vsel %vm2988_vm3, %v3275_v2, 0.0 }
  0x82   : > { %v679_v57 = vadd.f32 %v678_v25, %v635_v16  ;;  %v742_v17 = vadd.f32 %v741_v11, %v634_v5  ;;  %v3276_v55 = vmax.f32 %v1963_v53, -100.0  ;;  %vm603_vm13 = vcmp.eq.s32.totalorder %v2004_v15, %v1935_v21  ;;  %v3278_v16 = vld [vmem:[#allocation45_spill] sm:$0xff] }
  0x83   : > { %v647_v46 = vsel %vm2990_vm6, %v3277_v28, 0.0  ;;  %v701_v58 = vadd.f32 %v700_v4, %v636_v40  ;;  %v722_v6 = vadd.f32 %v721_v36, %v637_v14  ;;  %v648_v5 = vsel %vm2991_vm5, %v1575_v43, 0.0 }
  0x84   : > { %v993_v33 = vadd.f32 %v992_v37, %v3276_v55  ;;  %vm3279_vm4 = vcmp.eq.s32.totalorder %v2024_v30, %v1881_v27  ;;  %v680_v25 = vadd.f32 %v679_v57, %v639_v18  ;;  %v743_v11 = vadd.f32 %v742_v17, %v638_v3  ;;  %v3282_v18 = vld [vmem:[#allocation47_spill] sm:$0xff] }
  0x85   : > { %v649_v38 = vsel %vm3279_vm4, %v3278_v16, 0.0  ;;  %v3280_v31 = vmax.f32 %v1978_v48, -100.0  ;;  %vm2995_vm6 = vcmp.eq.s32.totalorder %v2034_v52, %v1935_v21  ;;  %vm2996_vm0 = vcmp.eq.s32.totalorder %v2019_v39, %v1975_v32  ;;  %v3287_v57 = vld [vmem:[#allocation51_spill] sm:$0xff] }
  0x86   : > { %v650_v43 = vsel %vm2992_vm1, %v1589_v9, 0.0  ;;  %v702_v40 = vadd.f32 %v701_v58, %v640_v47  ;;  %v723_v14 = vadd.f32 %v722_v6, %v641_v45  ;;  %vm3281_vm3 = vcmp.eq.s32.totalorder %v2004_v15, %v1897_v29 }
  0x87   : > { %v994_v37 = vadd.f32 %v993_v33, %v3280_v31  ;;  %v651_v3 = vsel %vm3281_vm3, %v1592_v54, 0.0  ;;  %v652_v42 = vsel %vm2993_vm2, %v3282_v18, 0.0  ;;  %v681_v4 = vadd.f32 %v680_v25, %v643_v12  ;;  %v3284_v54 = vld [vmem:[#allocation48_spill] sm:$0xff]  ;;  %v3290_v25 = vld [vmem:[#allocation53_spill] sm:$0xff]  ;;  %v3291_v31 = vld [vmem:[#allocation55_spill] sm:$0xff] }
  0x88   : > { %v744_v9 = vadd.f32 %v743_v11, %v642_v60  ;;  %v3283_v47 = vmax.f32 %v1980_v24, -100.0  ;;  %vm607_vm1 = vcmp.eq.s32.totalorder %v2004_v15, %v1961_v0  ;;  %vm608_vm5 = vcmp.eq.s32.totalorder %v2019_v39, %v1961_v0  ;;  %v3286_v60 = vld [vmem:[#allocation49_spill] sm:$0xff]  ;;  %v3293_v18 = vld [vmem:[#allocation56_spill] sm:$0xff] }
  0x89   : > { %vm2997_vm4 = vcmp.eq.s32.totalorder %v2024_v30, %v1961_v0  ;;  %vm3285_vm3 = vcmp.eq.s32.totalorder %v2024_v30, %v1897_v29  ;;  %v703_v50 = vadd.f32 %v702_v40, %v644_v19  ;;  %v724_v12 = vadd.f32 %v723_v14, %v645_v62  ;;  %v3289_v19 = vld [vmem:[#allocation52_spill] sm:$0xff]  ;;  %v3433_v24 = vld [vmem:[#allocation97_spill] sm:$0xff] }
  0x8a   : > { %v995_v45 = vadd.f32 %v994_v37, %v3283_v47  ;;  %v653_v36 = vsel %vm3285_vm3, %v3284_v54, 0.0  ;;  %vm610_vm2 = vcmp.eq.s32.totalorder %v2034_v52, %v1961_v0  ;;  %v654_v2 = vsel %vm594_vm12, %v3286_v60, 0.0  ;;  %v3298_v60 = vld [vmem:[#allocation60_spill] sm:$0xff] }
  0x8b   : > { %v655_v17 = vsel %vm595_vm8, %v3287_v57, 0.0  ;;  %v682_v55 = vadd.f32 %v681_v4, %v647_v46  ;;  %v745_v33 = vadd.f32 %v744_v9, %v646_v26  ;;  %v3288_v28 = vmax.f32 %v1989_v56, -100.0  ;;  %v3295_v9 = vld [vmem:[#allocation57_spill] sm:$0xff]  ;;  %v3426_v56 = vld [vmem:[#allocation95_spill] sm:$0xff] }
  0x8c   : > { %v656_v62 = vsel %vm596_vm7, %v3289_v19, 0.0  ;;  %v704_v6 = vadd.f32 %v703_v50, %v648_v5  ;;  %v725_v16 = vadd.f32 %v724_v12, %v649_v38  ;;  %v657_v11 = vsel %vm597_vm9, %v3290_v25, 0.0 }
  0x8d   : > { %v996_v58 = vadd.f32 %v995_v45, %v3288_v28  ;;  %v658_v26 = vsel %vm598_vm15, %v3291_v31, 0.0  ;;  %v683_v46 = vadd.f32 %v682_v55, %v651_v3  ;;  %v746_v37 = vadd.f32 %v745_v33, %v650_v43  ;;  %v3296_v45 = vld [vmem:[#allocation59_spill] sm:$0xff]  ;;  %v3299_v55 = vld [vmem:[#allocation61_spill] sm:$0xff] }
  0x8e   : > { %v3292_v40 = vmax.f32 %v1995_v59, -100.0  ;;  %vm3294_vm3 = vcmp.eq.s32.totalorder %v2004_v15, %v1926_v41  ;;  %v705_v38 = vadd.f32 %v704_v6, %v652_v42  ;;  %v726_v4 = vadd.f32 %v725_v16, %v653_v36  ;;  %v3300_v28 = vld [vmem:[#allocation63_spill] sm:$0xff]  ;;  %v3303_v16 = vld [vmem:[#allocation64_spill] sm:$0xff]  ;;  %v3305_v31 = vld [vmem:[#allocation65_spill] sm:$0xff] }
  0x8f   : > { %v659_v5 = vsel %vm3294_vm3, %v3293_v18, 0.0  ;;  %v660_v47 = vsel %vm600_vm10, %v3295_v9, 0.0  ;;  %v661_v43 = vsel %vm601_vm11, %v3296_v45, 0.0  ;;  %v684_v3 = vadd.f32 %v683_v46, %v655_v17 }
  0x90   : > { %v997_v14 = vadd.f32 %v996_v58, %v3292_v40  ;;  %v747_v54 = vadd.f32 %v746_v37, %v654_v2  ;;  %v3297_v50 = vmax.f32 %v1997_v44, -100.0  ;;  %v662_v42 = vsel %vm2994_vm14, %v3298_v60, 0.0  ;;  %v3306_v37 = vld [vmem:[#allocation72_spill] sm:$0xff]  ;;  %v3308_v40 = vld [vmem:[#allocation74_spill] sm:$0xff]  ;;  %v3316_v60 = vld [vmem:[#allocation69_spill] sm:$0xff] }
  0x91   : > { %v706_v36 = vadd.f32 %v705_v38, %v656_v62  ;;  %v727_v57 = vadd.f32 %v726_v4, %v657_v11  ;;  %v663_v33 = vsel %vm603_vm13, %v3299_v55, 0.0  ;;  %vm3301_vm3 = vcmp.eq.s32.totalorder %v2019_v39, %v1935_v21  ;;  %v3310_v4 = vld [vmem:[#allocation75_spill] sm:$0xff]  ;;  %v3425_v44 = vld [vmem:[#allocation124_spill] sm:$0xff] }
  0x92   : > { %v998_v12 = vadd.f32 %v997_v14, %v3297_v50  ;;  %v664_v2 = vsel %vm3301_vm3, %v3300_v28, 0.0  ;;  %v685_v17 = vadd.f32 %v684_v3, %v659_v5  ;;  %v748_v58 = vadd.f32 %v747_v54, %v658_v26  ;;  %v3314_v3 = vld [vmem:[#allocation67_spill] sm:$0xff]  ;;  %v3315_v50 = vld [vmem:[#allocation68_spill] sm:$0xff] }
  0x93   : > { %v3302_v19 = vmax.f32 %v1999_v13, -100.0  ;;  %vm3304_vm14 = vcmp.eq.s32.totalorder %v2024_v30, %v1935_v21  ;;  %v707_v25 = vadd.f32 %v706_v36, %v660_v47  ;;  %v728_v11 = vadd.f32 %v727_v57, %v661_v43  ;;  %v3312_v47 = vld [vmem:[#allocation77_spill] sm:$0xff] }
  0x94   : > { %v665_v62 = vsel %vm3304_vm14, %v3303_v16, 0.0  ;;  %v666_v46 = vsel %vm2995_vm6, %v3305_v31, 0.0  ;;  %vm3307_vm3 = vcmp.eq.s32.totalorder %v2004_v15, %v1975_v32  ;;  %v672_v14 = vsel %vm2996_vm0, %v3308_v40, 0.0  ;;  %v3324_v40 = vld [vmem:[#allocation23_spill] sm:$0xff] }
  0x95   : > { %v999_v6 = vadd.f32 %v998_v12, %v3302_v19  ;;  %v671_v26 = vsel %vm3307_vm3, %v3306_v37, 0.0  ;;  %v749_v18 = vadd.f32 %v748_v58, %v662_v42  ;;  %v3309_v5 = vmax.f32 %v2006_v49, -100.0 }
  0x96   : > { %vm3311_vm14 = vcmp.eq.s32.totalorder %v2024_v30, %v1975_v32  ;;  %vm3313_vm6 = vcmp.eq.s32.totalorder %v2034_v52, %v1975_v32  ;;  %v686_v43 = vadd.f32 %v685_v17, %v663_v33  ;;  %v667_v54 = vsel %vm607_vm1, %v3314_v3, 0.0  ;;  %v3318_v33 = vld [vmem:[#allocation71_spill] sm:$0xff] }
  0x97   : > { %v1000_v38 = vadd.f32 %v999_v6, %v3309_v5  ;;  %v673_v9 = vsel %vm3311_vm14, %v3310_v4, 0.0  ;;  %v674_v45 = vsel %vm3313_vm6, %v3312_v47, 0.0  ;;  %v668_v12 = vsel %vm608_vm5, %v3315_v50, 0.0  ;;  %v3327_v4 = vld [vmem:[#allocation24_spill] sm:$0xff]  ;;  %v3383_v32 = vld [vmem:[#allocation79_spill] sm:$0xff] }
  0x98   : > { %v669_v42 = vsel %vm2997_vm4, %v3316_v60, 0.0  ;;  %v708_v36 = vadd.f32 %v707_v25, %v664_v2  ;;  %v3317_v57 = vmax.f32 %v2012_v7, -100.0  ;;  %v670_v28 = vsel %vm610_vm2, %v3318_v33, 0.0  ;;  %v3343_v33 = vld [vmem:[#allocation44_spill] sm:$0xff] }
  0x99   : > { %vm3319_vm6 = vcmask 1045504   ;;  %v729_v58 = vadd.f32 %v728_v11, %v665_v62  ;;  %v750_v16 = vadd.f32 %v749_v18, %v666_v46  ;;  %v3323_v2 = vmax.f32 %v2014_v1, -100.0  ;;  %v3330_v46 = vld [vmem:[#allocation28_spill] sm:$0xff] }
  0x9a   : > { %v1001_v55 = vadd.f32 %v1000_v38, %v3317_v57  ;;  %v689_v17 = vsel %vm3319_vm6, %v671_v26, 0.0  ;;  %vm3320_vm3 = vmmov %vm3319_vm6  ;;  %v687_v37 = vadd.f32 %v686_v43, %v667_v54  ;;  %v3325_v5 = vmax.f32 %v3324_v40, -100.0  ;;  %v3336_v43 = vld [vmem:[#allocation37_spill] sm:$0xff] }
  0x9b   : > { %v710_v19 = vsel %vm3320_vm3, %v672_v14, 0.0  ;;  %vm3321_vm14 = vmmov %vm3320_vm3  ;;  %vm3326_vm4 = vcmp.eq.s32.totalorder %v2004_v15, %v3211_v8  ;;  %v3328_v26 = vmax.f32 %v3327_v4, -100.0  ;;  %vm3329_vm6 = vcmp.eq.s32.totalorder %v2019_v39, %v3211_v8 }
  0x9c   : > { %v731_v6 = vsel %vm3321_vm14, %v673_v9, 0.0  ;;  %vm3322_vm0 = vmmov %vm3320_vm3  ;;  %v1002_v25 = vadd.f32 %v1001_v55, %v3323_v2  ;;  %v760_v38 = vsel %vm3326_vm4, %v3325_v5, 0.0  ;;  %v709_v11 = vadd.f32 %v708_v36, %v668_v12  ;;  %v3333_v9 = vld [vmem:[#allocation32_spill] sm:$0xff]  ;;  %v3340_v36 = vld [vmem:[#allocation41_spill] sm:$0xff] }
  0x9d   : > { %v752_v31 = vsel %vm3322_vm0, %v674_v45, 0.0  ;;  %v761_v62 = vsel %vm3329_vm6, %v3328_v26, 0.0  ;;  %v3331_v14 = vmax.f32 %v3330_v46, -100.0  ;;  %vm3332_vm0 = vcmp.eq.s32.totalorder %v2024_v30, %v3211_v8  ;;  %v3346_v5 = vld [vmem:[#allocation46_spill] sm:$0xff]  ;;  %v3351_v26 = vld [vmem:[#allocation83_spill] sm:$0xff] }
  0x9e   : > { %v3334_v47 = vmax.f32 %v3333_v9, -100.0  ;;  %vm3335_vm3 = vcmp.eq.s32.totalorder %v2034_v52, %v3211_v8  ;;  %v3337_v3 = vmax.f32 %v3336_v43, -100.0  ;;  %vm3338_vm4 = vcmp.eq.s32.totalorder %v2004_v15, %v1789_v51  ;;  %v3356_v43 = vld [vmem:[#allocation117_spill] sm:$0xff] }
  0x9f   : > { %v762_v18 = vsel %vm3332_vm0, %v3331_v14, 0.0  ;;  %v3339_v50 = vmax.f32 %v2026_v63, -100.0  ;;  %v730_v60 = vadd.f32 %v729_v58, %v669_v42  ;;  %v3341_v57 = vmax.f32 %v3340_v36, -100.0  ;;  %v3349_v42 = vld [vmem:[#allocation50_spill] sm:$0xff] }
  0xa0   : > { %v763_v45 = vsel %vm3335_vm3, %v3334_v47, 0.0  ;;  %v764_v54 = vsel %vm3338_vm4, %v3337_v3, 0.0  ;;  %vm3342_vm14 = vcmp.eq.s32.totalorder %v2019_v39, %v1789_v51  ;;  %v3344_v2 = vmax.f32 %v3343_v33, -100.0  ;;  %v3353_v14 = vld [vmem:[#allocation54_spill] sm:$0xff] }
  0xa1   : > { %v1003_v12 = vadd.f32 %v1002_v25, %v3339_v50  ;;  %v765_v55 = vsel %vm3342_vm14, %v3341_v57, 0.0  ;;  %vm3345_vm6 = vcmp.eq.s32.totalorder %v2024_v30, %v1789_v51  ;;  %v751_v40 = vadd.f32 %v750_v16, %v670_v28  ;;  %v3358_v50 = vld [vmem:[#allocation58_spill] sm:$0xff] }
  0xa2   : > { %v766_v8 = vsel %vm3345_vm6, %v3344_v2, 0.0  ;;  %v3347_v4 = vmax.f32 %v3346_v5, -100.0  ;;  %vm3348_vm0 = vcmp.eq.s32.totalorder %v2034_v52, %v1789_v51  ;;  %v3350_v58 = vmax.f32 %v3349_v42, -100.0  ;;  %v3361_v57 = vld [vmem:[#allocation62_spill] sm:$0xff] }
  0xa3   : > { %vm3352_vm3 = vcmp.eq.s32.totalorder %v2004_v15, %v3351_v26  ;;  %v3354_v9 = vmax.f32 %v3353_v14, -100.0  ;;  %vm3355_vm4 = vcmp.eq.s32.totalorder %v2019_v39, %v3351_v26  ;;  %v3357_v28 = vmax.f32 %v3356_v43, -100.0 }
  0xa4   : > { %v767_v25 = vsel %vm3348_vm0, %v3347_v4, 0.0  ;;  %v768_v46 = vsel %vm3352_vm3, %v3350_v58, 0.0  ;;  %v690_v3 = vadd.f32 %v689_v17, %v687_v37  ;;  %v3359_v36 = vmax.f32 %v3358_v50, -100.0  ;;  %v3364_v4 = vld [vmem:[#allocation66_spill] sm:$0xff]  ;;  %v3366_v58 = vld [vmem:[#allocation84_spill] sm:$0xff] }
  0xa5   : > { %v769_v47 = vsel %vm3355_vm4, %v3354_v9, 0.0  ;;  %v1004_v16 = vadd.f32 %v1003_v12, %v3357_v28  ;;  %vm3360_vm14 = vcmp.eq.s32.totalorder %v2024_v30, %v3351_v26  ;;  %v3362_v33 = vmax.f32 %v3361_v57, -100.0  ;;  %v3368_v17 = vld [vmem:[#allocation70_spill] sm:$0xff]  ;;  %v3371_v9 = vld [vmem:[#allocation73_spill] sm:$0xff]  ;;  %v3376_v57 = vld [vmem:[#allocation76_spill] sm:$0xff] }
  0xa6   : > { %v770_v51 = vsel %vm3360_vm14, %v3359_v36, 0.0  ;;  %vm3363_vm6 = vcmp.eq.s32.totalorder %v2034_v52, %v3351_v26  ;;  %v711_v5 = vadd.f32 %v710_v19, %v709_v11  ;;  %v3365_v42 = vmax.f32 %v3364_v4, -100.0  ;;  %v3374_v50 = vld [vmem:[#allocation118_spill] sm:$0xff] }
  0xa7   : > { %v771_v2 = vsel %vm3363_vm6, %v3362_v33, 0.0  ;;  %vm3367_vm0 = vcmp.eq.s32.totalorder %v2004_v15, %v3366_v58  ;;  %v3369_v37 = vmax.f32 %v3368_v17, -100.0  ;;  %vm3370_vm3 = vcmp.eq.s32.totalorder %v2019_v39, %v3366_v58 }
  0xa8   : > { %v772_v12 = vsel %vm3367_vm0, %v3365_v42, 0.0  ;;  %v3372_v28 = vmax.f32 %v3371_v9, -100.0  ;;  %vm3373_vm4 = vcmp.eq.s32.totalorder %v2024_v30, %v3366_v58  ;;  %v3375_v19 = vmax.f32 %v3374_v50, -100.0  ;;  %v3379_v42 = vld [vmem:[#allocation78_spill] sm:$0xff] }
  0xa9   : > { %v773_v14 = vsel %vm3370_vm3, %v3369_v37, 0.0  ;;  %v732_v36 = vadd.f32 %v731_v6, %v730_v60  ;;  %v3377_v33 = vmax.f32 %v3376_v57, -100.0  ;;  %vm3378_vm14 = vcmp.eq.s32.totalorder %v2034_v52, %v3366_v58  ;;  %v3381_v37 = vld [vmem:[#allocation88_spill] sm:$0xff]  ;;  %v3399_v50 = vld [vmem:[#allocation86_spill] sm:$0xff] }
  0xaa   : > { %v774_v26 = vsel %vm3373_vm4, %v3372_v28, 0.0  ;;  %v1005_v11 = vadd.f32 %v1004_v16, %v3375_v19  ;;  %v3380_v17 = vmax.f32 %v3379_v42, -100.0  ;;  %vm3382_vm6 = vcmp.eq.s32.totalorder %v2004_v15, %v3381_v37  ;;  %v3386_v6 = vld [vmem:[#allocation80_spill] sm:$0xff]  ;;  %v3389_v28 = vld [vmem:[#allocation81_spill] sm:$0xff] }
  0xab   : > { %v775_v4 = vsel %vm3378_vm14, %v3377_v33, 0.0  ;;  %v753_v43 = vadd.f32 %v752_v31, %v751_v40  ;;  %v3384_v63 = vmax.f32 %v3383_v32, -100.0  ;;  %vm3385_vm0 = vcmp.eq.s32.totalorder %v2019_v39, %v3381_v37  ;;  %v3392_v33 = vld [vmem:[#allocation122_spill] sm:$0xff] }
  0xac   : > { %v776_v9 = vsel %vm3382_vm6, %v3380_v17, 0.0  ;;  %v3387_v60 = vmax.f32 %v3386_v6, -100.0  ;;  %vm3388_vm3 = vcmp.eq.s32.totalorder %v2024_v30, %v3381_v37  ;;  %v3390_v19 = vmax.f32 %v3389_v28, -100.0  ;;  %v3393_v32 = vld [vmem:[#allocation82_spill] sm:$0xff]  ;;  %v3396_v17 = vld [vmem:[#allocation85_spill] sm:$0xff] }
  0xad   : > { %v777_v16 = vsel %vm3385_vm0, %v3384_v63, 0.0  ;;  %vm3391_vm4 = vcmp.eq.s32.totalorder %v2034_v52, %v3381_v37  ;;  %v1007_v31 = vadd.f32 %v3392_v33, %v1005_v11  ;;  %v691_v40 = vrot.slane %v690_v3, 4  ;;  %v3402_v37 = vld [vmem:[#allocation87_spill] sm:$0xff] }
  0xae   : > { %v778_v58 = vsel %vm3388_vm3, %v3387_v60, 0.0  ;;  %v779_v57 = vsel %vm3391_vm4, %v3390_v19, 0.0  ;;  %v3394_v42 = vmax.f32 %v3393_v32, -100.0  ;;  %vm3395_vm14 = vcmp.eq.s32.totalorder %v2004_v15, %v1837_v22  ;;  %v3405_v32 = vld [vmem:[#allocation89_spill] sm:$0xff] }
  0xaf   : > { %v3397_v6 = vmax.f32 %v3396_v17, -100.0  ;;  %vm3398_vm6 = vcmp.eq.s32.totalorder %v2019_v39, %v1837_v22  ;;  %v712_v28 = vrot.slane %v711_v5, 4  ;;  %v3400_v0 = vmax.f32 %v3399_v50, -100.0  ;;  %v3409_v50 = vld [vmem:[#allocation90_spill] sm:$0xff] }
  0xb0   : > { %v780_v63 = vsel %vm3395_vm14, %v3394_v42, 0.0  ;;  %vm3401_vm0 = vcmp.eq.s32.totalorder %v2024_v30, %v1837_v22  ;;  %v3403_v19 = vmax.f32 %v3402_v37, -100.0  ;;  %vm3404_vm3 = vcmp.eq.s32.totalorder %v2034_v52, %v1837_v22  ;;  %v3412_v37 = vld [vmem:[#allocation91_spill] sm:$0xff] }
  0xb1   : > { %v781_v60 = vsel %vm3398_vm6, %v3397_v6, 0.0  ;;  %v782_v11 = vsel %vm3401_vm0, %v3400_v0, 0.0  ;;  %v3406_v42 = vmax.f32 %v3405_v32, -100.0  ;;  %vm3407_vm4 = vcmp.eq.s32.totalorder %v2004_v15, %v1851_v20  ;;  %v3408_v6 = vld [vmem:[#allocation123_spill] sm:$0xff]  ;;  %v3415_v32 = vld [vmem:[#allocation92_spill] sm:$0xff] }
  0xb2   : > { %v783_v33 = vsel %vm3404_vm3, %v3403_v19, 0.0  ;;  %v1009_v1 = vadd.f32 %v3408_v6, %v1007_v31  ;;  %v733_v7 = vrot.slane %v732_v36, 4  ;;  %v3410_v49 = vmax.f32 %v3409_v50, -100.0  ;;  %v3422_v50 = vld [vmem:[#allocation94_spill] sm:$0xff] }
  0xb3   : > { %v784_v17 = vsel %vm3407_vm4, %v3406_v42, 0.0  ;;  %vm3411_vm14 = vcmp.eq.s32.totalorder %v2019_v39, %v1851_v20  ;;  %v3413_v13 = vmax.f32 %v3412_v37, -100.0  ;;  %vm3414_vm6 = vcmp.eq.s32.totalorder %v2024_v30, %v1851_v20  ;;  %v3419_v42 = vld [vmem:[#allocation93_spill] sm:$0xff] }
  0xb4   : > { %v785_v0 = vsel %vm3411_vm14, %v3410_v49, 0.0  ;;  %v754_v19 = vrot.slane %v753_v43, 4  ;;  %v3416_v21 = vmax.f32 %v3415_v32, -100.0  ;;  %vm3417_vm0 = vcmp.eq.s32.totalorder %v2034_v52, %v1851_v20 }
  0xb5   : > { %v786_v22 = vsel %vm3414_vm6, %v3413_v13, 0.0  ;;  %v3420_v6 = vmax.f32 %v3419_v42, -100.0  ;;  %vm3421_vm3 = vcmp.eq.s32.totalorder %v2004_v15, %v1865_v23  ;;  %v3423_v37 = vmax.f32 %v3422_v50, -100.0  ;;  %v3429_v42 = vld [vmem:[#allocation96_spill] sm:$0xff] }
  0xb6   : > { %v2639_v31 = vsel %vm3417_vm0, %v3416_v21, 0.0  ;;  %vm3424_vm4 = vcmp.eq.s32.totalorder %v2019_v39, %v1865_v23  ;;  %v1011_v32 = vadd.f32 %v3425_v44, %v1009_v1  ;;  %v692_v59 = vadd.f32 %v691_v40, %v690_v3  ;;  %v3436_v1 = vld [vmem:[#allocation98_spill] sm:$0xff]  ;;  %v3440_v40 = vld [vmem:[#allocation99_spill] sm:$0xff] }
  0xb7   : > { %3418 = vst [vmem:[#allocation2_spill] sm:$0xff] %v2639_v31  ;;  %v788_v49 = vsel %vm3421_vm3, %v3420_v6, 0.0  ;;  %v2651_v13 = vsel %vm3424_vm4, %v3423_v37, 0.0  ;;  %v3427_v20 = vmax.f32 %v3426_v56, -100.0  ;;  %vm3428_vm14 = vcmp.eq.s32.totalorder %v2024_v30, %v1865_v23 }
  0xb8   : > { %v3430_v31 = vmax.f32 %v3429_v42, -100.0  ;;  %vm3431_vm6 = vcmp.eq.s32.totalorder %v2034_v52, %v1865_v23  ;;  %v713_v50 = vadd.f32 %v712_v28, %v711_v5  ;;  %v3434_v37 = vmax.f32 %v3433_v24, -100.0  ;;  %v3444_v5 = vld [vmem:[#allocation125_spill] sm:$0xff] }
  0xb9   : > { %v790_v21 = vsel %vm3428_vm14, %v3427_v20, 0.0  ;;  %vm3435_vm0 = vcmp.eq.s32.totalorder %v2004_v15, %v1881_v27  ;;  %v3437_v56 = vmax.f32 %v3436_v1, -100.0  ;;  %vm3438_vm3 = vcmp.eq.s32.totalorder %v2019_v39, %v1881_v27 }
  0xba   : > { %v2664_v6 = vsel %vm3431_vm6, %v3430_v31, 0.0  ;;  %v792_v44 = vsel %vm3435_vm0, %v3434_v37, 0.0  ;;  %v3441_v20 = vmax.f32 %v3440_v40, -100.0  ;;  %vm3442_vm4 = vcmp.eq.s32.totalorder %v2024_v30, %v1881_v27  ;;  %v3445_v31 = vld [vmem:[#allocation100_spill] sm:$0xff] }
  0xbb   : > { %3432 = vst [vmem:[#allocation3_spill] sm:$0xff] %v2664_v6  ;;  %v2676_v3 = vsel %vm3438_vm3, %v3437_v56, 0.0  ;;  %v1013_v24 = vadd.f32 %v3444_v5, %v1011_v32  ;;  %v734_v28 = vadd.f32 %v733_v7, %v732_v36  ;;  %v3446_v42 = vmax.f32 %v3445_v31, -100.0  ;;  %v3451_v7 = vld [vmem:[#allocation102_spill] sm:$0xff] }
  0xbc   : > { %3439 = vst [vmem:[#allocation4_spill] sm:$0xff] %v2676_v3  ;;  %v2683_v23 = vsel %vm3442_vm4, %v3441_v20, 0.0  ;;  %vm3447_vm14 = vcmp.eq.s32.totalorder %v2034_v52, %v1881_v27  ;;  %v820_v1 = vadd.f32 %v764_v54, %v760_v38  ;;  %v755_v56 = vadd.f32 %v754_v19, %v753_v43  ;;  %v3448_v3 = vld [vmem:[#allocation101_spill] sm:$0xff]  ;;  %v3454_v54 = vld [vmem:[#allocation104_spill] sm:$0xff] }
  0xbd   : > { %3443 = vst [vmem:[#allocation5_spill] sm:$0xff] %v2683_v23  ;;  %v2691_v37 = vsel %vm3447_vm14, %v3446_v42, 0.0  ;;  %v3449_v6 = vmax.f32 %v3448_v3, -100.0  ;;  %vm3450_vm6 = vcmp.eq.s32.totalorder %v2004_v15, %v1897_v29  ;;  %v841_v20 = vadd.f32 %v765_v55, %v761_v62  ;;  %1014 = vadd.xlane.f32.xlu0 %v1013_v24  ;;  %v3457_v55 = vld [vmem:[#allocation105_spill] sm:$0xff] }
  0xbe   : > { %v862_v23 = vadd.f32 %v766_v8, %v762_v18  ;;  %v693_v32 = vrot.slane %v692_v59, 2  ;;  %v3452_v36 = vmax.f32 %v3451_v7, -100.0  ;;  %vm3453_vm0 = vcmp.eq.s32.totalorder %v2019_v39, %v1897_v29 }
  0xbf   : > { %v796_v40 = vsel %vm3450_vm6, %v3449_v6, 0.0  ;;  %v821_v5 = vadd.f32 %v820_v1, %v768_v46  ;;  %v883_v31 = vadd.f32 %v767_v25, %v763_v45  ;;  %v714_v38 = vrot.slane %v713_v50, 2 }
  0xc0   : > { %v797_v27 = vsel %vm3453_vm0, %v3452_v36, 0.0  ;;  %v3455_v43 = vmax.f32 %v3454_v54, -100.0  ;;  %vm3456_vm3 = vcmp.eq.s32.totalorder %v2024_v30, %v1897_v29  ;;  %v842_v6 = vadd.f32 %v841_v20, %v769_v47 }
  0xc1   : > { %v863_v62 = vadd.f32 %v862_v23, %v770_v51  ;;  %v735_v18 = vrot.slane %v734_v28, 2  ;;  %v3458_v8 = vmax.f32 %v3457_v55, -100.0  ;;  %v822_v24 = vadd.f32 %v821_v5, %v772_v12  ;;  %v3472_v55 = vld [vmem:[#allocation2_spill] sm:$0xff] }
  0xc2   : > { %v798_v19 = vsel %vm3456_vm3, %v3455_v43, 0.0  ;;  %v884_v42 = vadd.f32 %v883_v31, %v771_v2  ;;  %v756_v46 = vrot.slane %v755_v56, 2  ;;  %v3459_v45 = vmax.f32 %v1944_v10, -100.0 }
  0xc3   : > { %v799_v3 = vsel %vm594_vm12, %v3458_v8, 0.0  ;;  %v843_v1 = vadd.f32 %v842_v6, %v773_v14  ;;  %v864_v7 = vadd.f32 %v863_v62, %v774_v26  ;;  %v694_v47 = vadd.f32 %v693_v32, %v692_v59  ;;  %v3473_v8 = vld [vmem:[#allocation111_spill] sm:$0xff] }
  0xc4   : > { %v800_v25 = vsel %vm595_vm8, %v3459_v45, 0.0  ;;  %v3460_v51 = vmax.f32 %v1954_v61, -100.0  ;;  %v823_v29 = vadd.f32 %v822_v24, %v776_v9  ;;  %v885_v20 = vadd.f32 %v884_v42, %v775_v4  ;;  %v3475_v42 = vld [vmem:[#allocation103_spill] sm:$0xff] }
  0xc5   : > { %v715_v12 = vadd.f32 %v714_v38, %v713_v50  ;;  %v3461_v2 = vmax.f32 %v1956_v34, -100.0  ;;  %v844_v36 = vadd.f32 %v843_v1, %v777_v16  ;;  %v865_v5 = vadd.f32 %v864_v7, %v778_v58  ;;  %v3465_v58 = vld [vmem:[#allocation108_spill] sm:$0xff] }
  0xc6   : > { %v801_v23 = vsel %vm596_vm7, %v3460_v51, 0.0  ;;  %v736_v14 = vadd.f32 %v735_v18, %v734_v28  ;;  %v3462_v59 = vmax.f32 %v1963_v53, -100.0  ;;  %v824_v26 = vadd.f32 %v823_v29, %v780_v63  ;;  %v3476_v1 = vld [vmem:[#allocation112_spill] sm:$0xff]  ;;  %v3479_v51 = vld [vmem:[#allocation3_spill] sm:$0xff] }
  0xc7   : > { %v802_v10 = vsel %vm597_vm9, %v3461_v2, 0.0  ;;  %v886_v32 = vadd.f32 %v885_v20, %v779_v57  ;;  %v757_v9 = vadd.f32 %v756_v46, %v755_v56  ;;  %v3463_v4 = vmax.f32 %v1978_v48, -100.0  ;;  %v3467_v57 = vld [vmem:[#allocation109_spill] sm:$0xff] }
  0xc8   : > { %v803_v61 = vsel %vm598_vm15, %v3462_v59, 0.0  ;;  %vm3464_vm12 = vcmp.eq.s32.totalorder %v2004_v15, %v1926_v41  ;;  %v845_v50 = vadd.f32 %v844_v36, %v781_v60  ;;  %v866_v31 = vadd.f32 %v865_v5, %v782_v11  ;;  %v3469_v11 = vld [vmem:[#allocation110_spill] sm:$0xff]  ;;  %v3480_v2 = vld [vmem:[#allocation113_spill] sm:$0xff]  ;;  %v3483_v59 = vld [vmem:[#allocation4_spill] sm:$0xff] }
  0xc9   : > { %v804_v34 = vsel %vm3464_vm12, %v3463_v4, 0.0  ;;  %v695_v16 = vrot.slane %v694_v47, 1  ;;  %v3466_v28 = vmax.f32 %v3465_v58, -100.0  ;;  %v825_v35 = vadd.f32 %v824_v26, %v784_v17 }
  0xca   : > { %v887_v38 = vadd.f32 %v886_v32, %v783_v33  ;;  %v716_v63 = vrot.slane %v715_v12, 1  ;;  %v3468_v56 = vmax.f32 %v3467_v57, -100.0  ;;  %v846_v54 = vadd.f32 %v845_v50, %v785_v0  ;;  %v3485_v32 = vld [vmem:[#allocation114_spill] sm:$0xff]  ;;  %v3491_v57 = vld [vmem:[#allocation116_spill] sm:$0xff] }
  0xcb   : > { %v805_v53 = vsel %vm600_vm10, %v3466_v28, 0.0  ;;  %v867_v43 = vadd.f32 %v866_v31, %v786_v22  ;;  %v737_v60 = vrot.slane %v736_v14, 1  ;;  %v3470_v6 = vmax.f32 %v3469_v11, -100.0  ;;  %v3490_v28 = vld [vmem:[#allocation106_spill] sm:$0xff] }
  0xcc   : > { %v806_v48 = vsel %vm601_vm11, %v3468_v56, 0.0  ;;  %vm3471_vm15 = vcmp.eq.s32.totalorder %v2034_v52, %v1926_v41  ;;  %v826_v18 = vadd.f32 %v825_v35, %v788_v49  ;;  %v888_v17 = vadd.f32 %v887_v38, %v3472_v55 }
  0xcd   : > { %v807_v62 = vsel %vm3471_vm15, %v3470_v6, 0.0  ;;  %v758_v33 = vrot.slane %v757_v9, 1  ;;  %v3474_v24 = vmax.f32 %v3473_v8, -100.0  ;;  %v847_v0 = vadd.f32 %v846_v54, %v2651_v13 }
  0xce   : > { %v868_v22 = vadd.f32 %v867_v43, %v790_v21  ;;  %v696_v45 = vadd.f32 %v695_v16, %v694_v47  ;;  %v3477_v7 = vmax.f32 %v3476_v1, -100.0  ;;  %vm3478_vm10 = vcmp.eq.s32.totalorder %v2019_v39, %v3475_v42  ;;  %v3484_v21 = vld [vmem:[#allocation5_spill] sm:$0xff]  ;;  %v3488_v16 = vld [vmem:[#allocation115_spill] sm:$0xff] }
  0xcf   : > { %v808_v46 = vsel %vm603_vm13, %v3474_v24, 0.0  ;;  %v827_v49 = vadd.f32 %v826_v18, %v792_v44  ;;  %v889_v29 = vadd.f32 %v888_v17, %v3479_v51  ;;  %v717_v20 = vadd.f32 %v716_v63, %v715_v12 }
  0xd0   : > { %v809_v41 = vsel %vm3478_vm10, %v3477_v7, 0.0  ;;  %v3481_v36 = vmax.f32 %v3480_v2, -100.0  ;;  %vm3482_vm11 = vcmp.eq.s32.totalorder %v2024_v30, %v3475_v42  ;;  %v848_v13 = vadd.f32 %v847_v0, %v3483_v59 }
  0xd1   : > { %v869_v47 = vadd.f32 %v868_v22, %v3484_v21  ;;  %v738_v26 = vadd.f32 %v737_v60, %v736_v14  ;;  %v3486_v4 = vmax.f32 %v3485_v32, -100.0  ;;  %vm3487_vm13 = vcmp.eq.s32.totalorder %v2034_v52, %v3475_v42  ;;  %v3509_v22 = vld [vmem:[#allocation118_spill] sm:$0xff] }
  0xd2   : > { %v810_v5 = vsel %vm3482_vm11, %v3481_v36, 0.0  ;;  %v828_v50 = vadd.f32 %v827_v49, %v796_v40  ;;  %v890_v12 = vadd.f32 %v889_v29, %v2691_v37  ;;  %v759_v31 = vadd.f32 %v758_v33, %v757_v9  ;;  %v3493_v40 = vld [vmem:[#allocation119_spill] sm:$0xff]  ;;  %v3495_v9 = vld [vmem:[#allocation17_spill] sm:$0xff] }
  0xd3   : > { %v811_v44 = vsel %vm3487_vm13, %v3486_v4, 0.0  ;;  %v3489_v58 = vmax.f32 %v3488_v16, -100.0  ;;  %v849_v38 = vadd.f32 %v848_v13, %v797_v27  ;;  %v870_v63 = vadd.f32 %v869_v47, %v798_v19  ;;  %v3497_v27 = vld [vmem:[#allocation120_spill] sm:$0xff] }
  0xd4   : > { %v3492_v14 = vmax.f32 %v3491_v57, -100.0  ;;  %v829_v54 = vadd.f32 %v828_v50, %v800_v25  ;;  %v891_v43 = vadd.f32 %v890_v12, %v799_v3  ;;  %1305 = vlog2.f32 %v696_v45  ;;  %v3500_v3 = vld [vmem:[#allocation20_spill] sm:$0xff] }
  0xd5   : > { %v812_v35 = vsel %vm607_vm1, %v3489_v58, 0.0  ;;  %v3494_v37 = vmax.f32 %v3493_v40, -100.0  ;;  %vm3496_vm8 = vcmp.eq.s32.totalorder %v2004_v15, %v3495_v9  ;;  %v850_v11 = vadd.f32 %v849_v38, %v801_v23  ;;  %v3503_v23 = vld [vmem:[#allocation117_spill] sm:$0xff] }
  0xd6   : > { %v813_v56 = vsel %vm608_vm5, %v3492_v14, 0.0  ;;  %v871_v6 = vadd.f32 %v870_v63, %v802_v10  ;;  %1307 = vlog2.f32 %v717_v20  ;;  %v3498_v19 = vmax.f32 %v3497_v27, -100.0 }
  0xd7   : > { %v816_v60 = vsel %vm3496_vm8, %v3494_v37, 0.0  ;;  %vm3499_vm1 = vcmp.eq.s32.totalorder %v2019_v39, %v3495_v9  ;;  %v830_v55 = vadd.f32 %v829_v54, %v804_v34  ;;  %v892_v17 = vadd.f32 %v891_v43, %v803_v61  ;;  %v3506_v39 = vld [vmem:[#allocation121_spill] sm:$0xff] }
  0xd8   : > { %v817_v18 = vsel %vm3499_vm1, %v3498_v19, 0.0  ;;  %1309 = vlog2.f32 %v738_v26  ;;  %v3501_v25 = vmax.f32 %v3500_v3, -100.0  ;;  %vm3502_vm5 = vcmp.eq.s32.totalorder %v2024_v30, %v3495_v9 }
  0xd9   : > { %v851_v15 = vadd.f32 %v850_v11, %v805_v53  ;;  %v872_v8 = vadd.f32 %v871_v6, %v806_v48  ;;  %1311 = vlog2.f32 %v759_v31  ;;  %v3504_v10 = vmax.f32 %v3503_v23, -100.0 }
  0xda   : > { %v818_v33 = vsel %vm3502_vm5, %v3501_v25, 0.0  ;;  %vm3505_vm7 = vcmp.eq.s32.totalorder %v2024_v30, %v3490_v28  ;;  %v3507_v42 = vmax.f32 %v3506_v39, -100.0  ;;  %vm3508_vm9 = vcmp.eq.s32.totalorder %v2034_v52, %v3495_v9 }
  0xdb   : > { %v814_v24 = vsel %vm3505_vm7, %v3504_v10, 0.0  ;;  %v831_v34 = vadd.f32 %v830_v55, %v808_v46  ;;  %v893_v0 = vadd.f32 %v892_v17, %v807_v62  ;;  %v3510_v45 = vmax.f32 %v3509_v22, -100.0 }
  0xdc   : > { %v819_v61 = vsel %vm3508_vm9, %v3507_v42, 0.0  ;;  %vm3511_vm4 = vcmask 1045504   ;;  %v852_v1 = vadd.f32 %v851_v15, %v809_v41  ;;  %v873_v7 = vadd.f32 %v872_v8, %v810_v5  ;;  %v3515_v42 = vld [vmem:[#allocation9_spill] sm:$0xff] }
  0xdd   : > { %v815_v53 = vsel %vm610_vm2, %v3510_v45, 0.0  ;;  %v833_v48 = vsel %vm3511_vm4, %v816_v60, 0.0  ;;  %v832_v30 = vadd.f32 %v831_v34, %v812_v35  ;;  %vm3512_vm14 = vmmov %vm3511_vm4  ;;  %v894_v29 = vadd.f32 %v893_v0, %v811_v44 }
  0xde   : > { %v854_v49 = vsel %vm3512_vm14, %v817_v18, 0.0  ;;  %vm3513_vm6 = vmmov %vm3511_vm4  ;;  %v853_v20 = vadd.f32 %v852_v1, %v813_v56  ;;  %v874_v2 = vadd.f32 %v873_v7, %v814_v24  ;;  %v1306_v52 = vpop.eup %1305  ;;  %v1337_v35 = vmov 1966171168   ;;  %v3516_v1 = vld [vmem:[#allocation107_spill] sm:$0xff] }
  0xdf   : > { %v875_v51 = vsel %vm3513_vm6, %v818_v33, 0.0  ;;  %vm3514_vm0 = vmmov %vm3511_vm4  ;;  %v834_v46 = vadd.f32 %v833_v48, %v832_v30  ;;  %v895_v36 = vadd.f32 %v894_v29, %v815_v53  ;;  %v905_v28 = vmul.f32 0.6931472, %v1306_v52 }
  0xe0   : > { %v896_v62 = vsel %vm3514_vm0, %v819_v61, 0.0  ;;  %v855_v59 = vadd.f32 %v854_v49, %v853_v20  ;;  %v876_v13 = vadd.f32 %v875_v51, %v874_v2  ;;  %v1308_v26 = vpop.eup %1307  ;;  %v928_v38 = vunpack.c.l.s4 %v1337_v35 }
  0xe1   : > { %v835_v21 = vrot.slane %v834_v46, 4  ;;  %v897_v47 = vadd.f32 %v896_v62, %v895_v36  ;;  %v907_v14 = vmul.f32 0.6931472, %v1308_v26  ;;  %v912_v6 = vmax.f32 %v905_v28, -100.0 }
  0xe2   : > { %v856_v41 = vrot.slane %v855_v59, 4  ;;  %v877_v5 = vrot.slane %v876_v13, 4  ;;  %v1310_v32 = vpop.eup %1309  ;;  %v929_v27 = vunpack.c.0.s8 %v928_v38  ;;  %vm916_vm2 = vcmp.ge.s32.totalorder %v3516_v1, 1 }
  0xe3   : > { %v836_v4 = vadd.f32 %v835_v21, %v834_v46  ;;  %v898_v50 = vrot.slane %v897_v47, 4  ;;  %v1312_v12 = vpop.eup %1311  ;;  %v909_v56 = vmul.f32 0.6931472, %v1310_v32  ;;  %v913_v55 = vmax.f32 %v907_v14, -100.0 }
  0xe4   : > { %v857_v31 = vadd.f32 %v856_v41, %v855_v59  ;;  %v878_v44 = vadd.f32 %v877_v5, %v876_v13  ;;  %v911_v40 = vmul.f32 0.6931472, %v1312_v12  ;;  %v932_v61 = vsub.s32 %v929_v27, %v3515_v42 }
  0xe5   : > { %v837_v16 = vrot.slane %v836_v4, 2  ;;  %v899_v58 = vadd.f32 %v898_v50, %v897_v47  ;;  %v914_v17 = vmax.f32 %v909_v56, -100.0  ;;  %vm1044_vm3 = vcmask 1040384  }
  0xe6   : > { %v858_v63 = vrot.slane %v857_v31, 2  ;;  %v879_v57 = vrot.slane %v878_v44, 2  ;;  %v915_v33 = vmax.f32 %v911_v40, -100.0  ;;  %v3517_v49 = vsub.s32 0, %v3515_v42 }
  0xe7   : > { %v838_v54 = vadd.f32 %v837_v16, %v836_v4  ;;  %v900_v43 = vrot.slane %v899_v58, 2  ;;  %v3518_v29 = vsub.s32 1, %v3515_v42  ;;  %v3519_v2 = vsub.s32 2, %v3515_v42 }
  0xe8   : > { %v859_v37 = vadd.f32 %v858_v63, %v857_v31  ;;  %v880_v9 = vadd.f32 %v879_v57, %v878_v44  ;;  %v3520_v46 = vsub.s32 3, %v3515_v42  ;;  %vm205_vm12 = vcmask 0  }
  0xe9   : > { %v839_v60 = vrot.slane %v838_v54, 1  ;;  %v901_v11 = vadd.f32 %v900_v43, %v899_v58  ;;  %v1338_v5 = vmov 0.0  }
  0xea   : > { %v860_v19 = vrot.slane %v859_v37, 1  ;;  %v881_v18 = vrot.slane %v880_v9, 1  ;;  %206 = vst.msk [vmem:[%s200_s23] sm:$0x1] %vm205_vm12, %v1338_v5 }
  0xeb   : > { %v840_v3 = vadd.f32 %v839_v60, %v838_v54  ;;  %v902_v25 = vrot.slane %v901_v11, 1 }
  0xec   : > { %v861_v15 = vadd.f32 %v860_v19, %v859_v37  ;;  %v882_v8 = vadd.f32 %v881_v18, %v880_v9 }
  0xed   : > { %v903_v23 = vadd.f32 %v902_v25, %v901_v11  ;;  %v917_v10 = vsub.f32 %v912_v6, %v840_v3 }
  0xee   : > { %v918_v24 = vsub.f32 %v913_v55, %v861_v15  ;;  %v919_v39 = vsub.f32 %v914_v17, %v882_v8 }
  0xef   : > { %v920_v34 = vsub.f32 %v915_v33, %v903_v23 }
  0xf0   : > { %v925_v0 = vcombine.low %v917_v10, %v918_v24 }
  0xf1   : > { %v926_v22 = vcombine.low %v919_v39, %v920_v34  ;;  %v1062_v56 = vld [vmem:[%s200_s23] sm:$0x1] }
  0xf2   : > { %v933_v45 = vrot.slane %v925_v0, %v932_v61 }
  0xf3   : > { %v940_v53 = vrot.slane %v926_v22, %v932_v61 }
  0xf5   : > { %v941_v48 = vcombine.low %v933_v45, %v940_v53 }
  0xf7   : > { %v948_v7 = vrot.slane %v941_v48, %v932_v61 }
  0xf9   : > { %v950_v30 = vsel %vm916_vm2, %v948_v7, 0.0 }
  0xfa   : > { %v1027_v51 = vrot.slane %v950_v30, %v3517_v49  ;;  %v1031_v20 = vrot.slane %v950_v30, %v3518_v29  ;;  %v1035_v62 = vrot.slane %v950_v30, %v3519_v2  ;;  %v1039_v36 = vrot.slane %v950_v30, %v3520_v46 }
  0xfc   : > { %v1045_v59 = vsel %vm1044_vm3, %v1027_v51, 0.0  ;;  %v1046_v13 = vsel %vm1044_vm3, %v1031_v20, 0.0  ;;  %v1048_v52 = vsel %vm1044_vm3, %v1035_v62, 0.0  ;;  %v1050_v47 = vsel %vm1044_vm3, %v1039_v36, 0.0 }
  0xfd   : > { %v1047_v21 = vadd.f32 %v1046_v13, %v1045_v59 }
  0xff   : > { %v1049_v26 = vadd.f32 %v1048_v52, %v1047_v21 }
 0x101   : > { %v1051_v41 = vadd.f32 %v1050_v47, %v1049_v26 }
 0x103   : > { %1052 = vadd.xlane.f32.xlu0 %v1051_v41 }
 0x14a   : > { %v1015_v32 = vpop.xlane.xlu0 %1014 }
 0x14b   : > { %v1016_v4 = vrot.slane %v1015_v32, 4 }
 0x14d   : > { %v1017_v50 = vadd.f32 %v1016_v4, %v1015_v32 }
 0x14f   : > { %v1018_v12 = vrot.slane %v1017_v50, 2 }
 0x151   : > { %v1019_v31 = vadd.f32 %v1018_v12, %v1017_v50 }
 0x153   : > { %v1020_v44 = vrot.slane %v1019_v31, 1 }
 0x155   : > { %v1021_v16 = vadd.f32 %v1020_v44, %v1019_v31 }
 0x157   : > { %1155 = vpush %v1021_v16 }
 0x188   : > { %s1156_s24 = spop %1155 }
 0x190   : > { %v1053_v58 = vpop.xlane.xlu0 %1052 }
 0x191   : > { %v1054_v28 = vrot.slane %v1053_v58, 4 }
 0x193   : > { %v1055_v35 = vadd.f32 %v1054_v28, %v1053_v58 }
 0x195   : > { %v1056_v38 = vrot.slane %v1055_v35, 2 }
 0x197   : > { %v1057_v63 = vadd.f32 %v1056_v38, %v1055_v35 }
 0x199   : > { %v1058_v57 = vrot.slane %v1057_v63, 1 }
 0x19b   : > { %v1059_v14 = vadd.f32 %v1058_v57, %v1057_v63 }
 0x19d   : > { %1157 = vpush %v1059_v14 }
 0x1ce   : > { %s1158_s25 = spop %1157 }
 0x1cf   : > { %s1061_s26 = sadd.f32 %s1158_s25, %s1156_s24 }
 0x1d1   : > { %s1063_s27 = ssub.f32 0.0, %s1061_s26 }
 0x1d3   : > { %s1064_s28 = smul.f32 0.0009765625, %s1063_s27 }
 0x1d5   : > { %v1065_v54 = vstv %s1064_s28 }
 0x1d6   : > { %v1066_v43 = vadd.f32 %v1065_v54, %v1062_v56 }
 0x1d8   : > { %1068 = vst.msk [vmem:[%s200_s23] sm:$0x1] %vm205_vm12, %v1066_v43 }
 0x1d9 PF: > { %s12_s11 = sadd.s32 1, %s1335_s11   ;;  %s3521_s9 = smov %s1331_s10 }
 0x1da   : > { %p9_p5 = scmp.ge.s32.totalorder %s12_s11, 4   ;;  %s3522_s10 = smov %s3524_s12 }
 0x1dc   :  { %11 = sbr.rel (!%p9_p5) target bundleno = 2 (0x2), region = 65 }

</bundles_post_ra>
